<compile_context>
chip_gen: v5e
topology: v5e:2x2
jax: 0.10.0
libtpu: 0.0.40
codegen_flags: <defaults>
</compile_context>

<pallas_src>
import functools
import numpy as np
import jax
import jax.numpy as jnp
from jax.experimental import pallas as pl
from jax.experimental.pallas import tpu as pltpu

# ----------------------- configuration ("args") -----------------------
TOK_SIZE = 50
EMB_DIM = 32
POSTAG_SIZE = 20
POSTAG_DIM = 16
IN_DIM = EMB_DIM + POSTAG_DIM          # 48
RNN_HIDDEN = 32
INDIM = RNN_HIDDEN * 2                 # 64
SPAN_MAX_LEN = 3
SPAN_WIDTH_DIM = 16
TRIPLET_DIST_DIM = 16
FNN_HIDDEN = 64
CLASS_NUM = 3                          # spans2id = {'O':0, 'aspect':1, 'opinion':2}
SENTIMENT_CLASS = 4
SPAN_PRUNED_THRESHOLD = 0.5
BUCKET_BINS = [0, 1, 2, 3, 4, 5, 7, 8, 15, 16, 31, 32, 63, 64]

SPAN_DIM = INDIM * 2 + SPAN_WIDTH_DIM              # 144
PAIRS_DIM = 2 * SPAN_DIM + TRIPLET_DIST_DIM        # 304

_OUT_LANES = 128                                   # lane-dense MLP output width
_HID_LANES = 128                                   # FNN hidden padded 64 -> 128
_NEG_BIG = -1e30                                   # softmax pad-lane mask (f32 only)


# ----------------------------- shared MLP body -----------------------------
def _mlp3_softmax(feat_bf16, w1, b1, w2, b2, w3, b3):
    """Linear-ReLU-Linear-ReLU-Linear-Softmax on a lane-dense 128-wide slab.
    Pad hidden lanes are exact zeros (zero-padded weights/biases); pad output
    lanes carry -1e30 baked into b3 so they vanish in the softmax.  Exact
    divide (one per row) so probabilities sum to 1."""
    h1 = jnp.maximum(
        jnp.dot(feat_bf16, w1, preferred_element_type=jnp.float32) + b1, 0.0)
    h2 = jnp.maximum(
        jnp.dot(h1.astype(jnp.bfloat16), w2, preferred_element_type=jnp.float32)
        + b2, 0.0)
    logits = (jnp.dot(h2.astype(jnp.bfloat16), w3,
                      preferred_element_type=jnp.float32) + b3)
    m = jnp.max(logits, axis=-1, keepdims=True)
    e = jnp.exp(logits - m)
    s = jnp.sum(e, axis=-1, keepdims=True)
    return e / s


# ----------------------------- Pallas kernels -----------------------------
def bilstm_fused_kernel(x_ref, wih_ref, whh_ref, b_ref, out_ref, *,
                        seq_len, bp, hidden):
    """Both LSTM directions in one body.  x_ref: (L*Bp, 2D) where lanes 0:D are
    x[t] and D:2D are x[L-1-t] (backward time).  Gate columns are interleaved
    [i_f,i_b | f_f,f_b | g_f,g_b | o_f,o_b].  Output (L*Bp, 2H) natural time,
    lanes [h_fwd | h_bwd].  The non-recurrent projection is hoisted out of the
    recurrence; only the (Bp,2H)x(2H,8H) recurrent matmul stays in the (fully
    unrolled) loop.  Per-step output stores are (8,32)-aligned and off the
    recurrence critical path."""
    L, Bp, H = seq_len, bp, hidden
    gx = (jnp.dot(x_ref[...], wih_ref[...], preferred_element_type=jnp.float32)
          + b_ref[...])                               # (L*Bp, 8H) f32
    w_hh = whh_ref[...]                               # (2H, 8H) bf16

    h = jnp.zeros((Bp, 2 * H), jnp.float32)           # [h_f | h_b]
    c = jnp.zeros((Bp, 2 * H), jnp.float32)           # [c_f | c_b]
    for t in range(L):                                # static full unroll
        g = gx[t * Bp:(t + 1) * Bp, :] + jnp.dot(
            h.astype(w_hh.dtype), w_hh, preferred_element_type=jnp.float32)
        sg = jax.nn.sigmoid(g)                        # full 256-lane EUP pass
        tg = jnp.tanh(g)                              # full 256-lane EUP pass
        i_g = sg[:, 0 * H:2 * H]
        f_g = sg[:, 2 * H:4 * H]
        g_g = tg[:, 4 * H:6 * H]
        o_g = sg[:, 6 * H:8 * H]
        c = f_g * c + i_g * g_g                       # f32 cell state
        h = o_g * jnp.tanh(c)
        out_ref[t * Bp:(t + 1) * Bp, 0:H] = h[:, 0:H]                 # fwd @ t
        out_ref[(L - 1 - t) * Bp:(L - t) * Bp, H:2 * H] = h[:, H:2 * H]  # bwd @ L-1-t


def span_fused_kernel(x_ref, wtab_ref, w1_ref, b1_ref, w2_ref, b2_ref,
                      w3_ref, b3_ref, prob_ref, feat_ref, *, span_list, bp):
    """Fused span feature construction + span_fnn + softmax.
    x_ref: (L*Bp, 2H) LSTM output (VMEM resident).  Span endpoints / width
    buckets are static Python constants, so the gather is fully unrolled with
    static slices.  Also writes the (S*Bp, SPAN_DIM) feature slab (consumed by
    the pair kernel)."""
    Bp = bp
    H2 = x_ref.shape[-1]                              # 2H
    W = wtab_ref.shape[-1]
    # Only a handful of distinct width buckets -> hoist the broadcasts.
    wrows = {bk: jnp.broadcast_to(wtab_ref[bk:bk + 1, :], (Bp, W))
             for bk in sorted({bk for (_, _, bk) in span_list})}
    for s, (st, en, bk) in enumerate(span_list):
        r0 = s * Bp
        feat_ref[r0:r0 + Bp, 0:H2] = x_ref[st * Bp:(st + 1) * Bp, :]
        feat_ref[r0:r0 + Bp, H2:2 * H2] = x_ref[(en - 1) * Bp:en * Bp, :]
        feat_ref[r0:r0 + Bp, 2 * H2:2 * H2 + W] = wrows[bk]
    feat = feat_ref[...].astype(jnp.bfloat16)
    prob_ref[...] = _mlp3_softmax(feat, w1_ref[...], b1_ref[...], w2_ref[...],
                                  b2_ref[...], w3_ref[...], b3_ref[...])


def pair_fused_kernel(meta_ref, spans_ref, demb_ref, w1_ref, b1_ref, w2_ref,
                      b2_ref, w3_ref, b3_ref, prob_ref, feat_ref, *,
                      n_rows, rows_pad, batch, n_pairs):
    """Fused pair feature construction + pairs_fnn + softmax.
    meta_ref (SMEM, scalar prefetch): (3, B*P) int32 rows = [target span idx,
    opinion span idx, distance bucket].  spans_ref: (S, Bp, SPAN_DIM) span
    feature slab (VMEM resident, dynamic leading-axis gather).  demb_ref:
    (n_buckets, 1, Td) distance-embedding table."""
    d1 = spans_ref.shape[-1]
    td = demb_ref.shape[-1]
    for b in range(batch):                            # static unroll (rows = B*P)
        for p in range(n_pairs):
            r = b * n_pairs + p
            t_idx = meta_ref[0, r]
            o_idx = meta_ref[1, r]
            d_idx = meta_ref[2, r]
            row_t = spans_ref[t_idx]                  # (Bp, SPAN_DIM) dyn gather
            row_o = spans_ref[o_idx]
            feat_ref[r:r + 1, 0:d1] = row_t[b:b + 1, :]
            feat_ref[r:r + 1, d1:2 * d1] = row_o[b:b + 1, :]
            feat_ref[r:r + 1, 2 * d1:2 * d1 + td] = demb_ref[d_idx]
    if rows_pad > n_rows:                             # zero any pad rows
        feat_ref[n_rows:rows_pad, :] = jnp.zeros(
            (rows_pad - n_rows, 2 * d1 + td), jnp.float32)
    feat = feat_ref[...].astype(jnp.bfloat16)
    prob_ref[...] = _mlp3_softmax(feat, w1_ref[...], b1_ref[...], w2_ref[...],
                                  b2_ref[...], w3_ref[...], b3_ref[...])


# ----------------------------- kernel wrappers -----------------------------
def bilstm(x_bld, lstm):
    """Fused bidirectional single-layer LSTM.  x_bld: (B, L, D) f32.
    Returns (L*Bp, 2H) f32, natural time order, lanes [h_fwd | h_bwd]."""
    B, L, D = x_bld.shape
    H = RNN_HIDDEN
    Bp = max(8, ((B + 7) // 8) * 8)                   # 8-row tile alignment

    x_t = jnp.transpose(x_bld, (1, 0, 2))             # (L, B, D) time-major
    x_t = jnp.pad(x_t, ((0, 0), (0, Bp - B), (0, 0)))
    x_fused = jnp.concatenate([x_t, x_t[::-1]], axis=-1)       # (L, Bp, 2D)
    x_flat = x_fused.reshape(L * Bp, 2 * D).astype(jnp.bfloat16)

    out = pl.pallas_call(
        functools.partial(bilstm_fused_kernel, seq_len=L, bp=Bp, hidden=H),
        out_shape=jax.ShapeDtypeStruct((L * Bp, 2 * H), jnp.float32),
        grid=(1,),
        in_specs=[
            pl.BlockSpec((L * Bp, 2 * D), lambda i: (0, 0)),
            pl.BlockSpec((2 * D, 8 * H), lambda i: (0, 0)),
            pl.BlockSpec((2 * H, 8 * H), lambda i: (0, 0)),
            pl.BlockSpec((1, 8 * H), lambda i: (0, 0)),
        ],
        out_specs=pl.BlockSpec((L * Bp, 2 * H), lambda i: (0, 0)),
    )(x_flat, lstm['w_ih'], lstm['w_hh'], lstm['b'])
    return out, Bp


def span_forward(sent_out_2d, width_table, span_list, mlp, B, Bp):
    """Fused span features + span_fnn.  Returns ((B,S,CLASS_NUM) probs,
    (S, Bp, SPAN_DIM) feature slab)."""
    rows, H2 = sent_out_2d.shape
    S = len(span_list)
    W = width_table.shape[-1]
    span_dim = 2 * H2 + W

    prob, feat = pl.pallas_call(
        functools.partial(span_fused_kernel, span_list=span_list, bp=Bp),
        out_shape=(jax.ShapeDtypeStruct((S * Bp, _OUT_LANES), jnp.float32),
                   jax.ShapeDtypeStruct((S * Bp, span_dim), jnp.float32)),
        grid=(1,),
        in_specs=[
            pl.BlockSpec((rows, H2), lambda i: (0, 0)),
            pl.BlockSpec(width_table.shape, lambda i: (0, 0)),
            pl.BlockSpec(mlp['w1'].shape, lambda i: (0, 0)),
            pl.BlockSpec(mlp['b1'].shape, lambda i: (0, 0)),
            pl.BlockSpec(mlp['w2'].shape, lambda i: (0, 0)),
            pl.BlockSpec(mlp['b2'].shape, lambda i: (0, 0)),
            pl.BlockSpec(mlp['w3'].shape, lambda i: (0, 0)),
            pl.BlockSpec(mlp['b3'].shape, lambda i: (0, 0)),
        ],
        out_specs=(pl.BlockSpec((S * Bp, _OUT_LANES), lambda i: (0, 0)),
                   pl.BlockSpec((S * Bp, span_dim), lambda i: (0, 0))),
    )(sent_out_2d, width_table, mlp['w1'], mlp['b1'], mlp['w2'], mlp['b2'],
      mlp['w3'], mlp['b3'])

    probs = jnp.transpose(
        prob.reshape(S, Bp, _OUT_LANES)[:, :B, :CLASS_NUM], (1, 0, 2))
    spans_feat = feat.reshape(S, Bp, span_dim)        # free metadata reshape
    return probs, spans_feat


def pair_forward(spans_feat, dist_table_3d, meta, mlp, B, P):
    """Fused pair features + pairs_fnn.  Returns (B, P, SENTIMENT_CLASS)."""
    S, Bp, D1 = spans_feat.shape
    Td = dist_table_3d.shape[-1]
    pairs_dim = 2 * D1 + Td
    R = B * P
    Rp = ((R + 7) // 8) * 8

    prob = pl.pallas_call(
        functools.partial(pair_fused_kernel, n_rows=R, rows_pad=Rp,
                          batch=B, n_pairs=P),
        out_shape=jax.ShapeDtypeStruct((Rp, _OUT_LANES), jnp.float32),
        grid_spec=pltpu.PrefetchScalarGridSpec(
            num_scalar_prefetch=1,
            grid=(1,),
            in_specs=[
                pl.BlockSpec((S, Bp, D1), lambda i, m: (0, 0, 0)),
                pl.BlockSpec(dist_table_3d.shape, lambda i, m: (0, 0, 0)),
                pl.BlockSpec(mlp['w1'].shape, lambda i, m: (0, 0)),
                pl.BlockSpec(mlp['b1'].shape, lambda i, m: (0, 0)),
                pl.BlockSpec(mlp['w2'].shape, lambda i, m: (0, 0)),
                pl.BlockSpec(mlp['b2'].shape, lambda i, m: (0, 0)),
                pl.BlockSpec(mlp['w3'].shape, lambda i, m: (0, 0)),
                pl.BlockSpec(mlp['b3'].shape, lambda i, m: (0, 0)),
            ],
            out_specs=pl.BlockSpec((Rp, _OUT_LANES), lambda i, m: (0, 0)),
            scratch_shapes=[pltpu.VMEM((Rp, pairs_dim), jnp.float32)],
        ),
    )(meta, spans_feat, dist_table_3d, mlp['w1'], mlp['b1'], mlp['w2'],
      mlp['b2'], mlp['w3'], mlp['b3'])

    return prob[:R, :SENTIMENT_CLASS].reshape(B, P, SENTIMENT_CLASS)


# ----------------------------- parameter init -----------------------------
def init_params(key):
    ks = list(jax.random.split(key, 24))

    def nrm(k, shape, scale=0.1):
        return (scale * jax.random.normal(k, shape)).astype(jnp.float32)

    p = {}
    emb = nrm(ks[0], (TOK_SIZE, EMB_DIM))
    p['emb'] = emb.at[0].set(0.0)                       # padding_idx=0
    pos = nrm(ks[1], (POSTAG_SIZE, POSTAG_DIM))
    p['postag_emb'] = pos.at[0].set(0.0)                # padding_idx=0

    H4 = 4 * RNN_HIDDEN
    p['lstm_wih_f'] = nrm(ks[2], (IN_DIM, H4))          # gate order [i,f,g,o]
    p['lstm_whh_f'] = nrm(ks[3], (RNN_HIDDEN, H4))
    p['lstm_b_f'] = nrm(ks[4], (1, H4))                 # = b_ih + b_hh
    p['lstm_wih_b'] = nrm(ks[5], (IN_DIM, H4))
    p['lstm_whh_b'] = nrm(ks[6], (RNN_HIDDEN, H4))
    p['lstm_b_b'] = nrm(ks[7], (1, H4))

    p['span_width_emb'] = nrm(ks[8], (len(BUCKET_BINS), SPAN_WIDTH_DIM))
    p['dist_emb'] = nrm(ks[9], (len(BUCKET_BINS), TRIPLET_DIST_DIM))

    p['span_w1'] = nrm(ks[10], (SPAN_DIM, FNN_HIDDEN),
                       scale=float(np.sqrt(2.0 / (SPAN_DIM + FNN_HIDDEN))))
    p['span_b1'] = jnp.zeros((1, FNN_HIDDEN), jnp.float32)
    p['span_w2'] = nrm(ks[11], (FNN_HIDDEN, FNN_HIDDEN),
                       scale=float(np.sqrt(2.0 / (2 * FNN_HIDDEN))))
    p['span_b2'] = jnp.zeros((1, FNN_HIDDEN), jnp.float32)
    p['span_w3'] = nrm(ks[12], (FNN_HIDDEN, CLASS_NUM),
                       scale=float(np.sqrt(2.0 / (FNN_HIDDEN + CLASS_NUM))))
    p['span_b3'] = jnp.zeros((1, CLASS_NUM), jnp.float32)

    p['pair_w1'] = nrm(ks[13], (PAIRS_DIM, FNN_HIDDEN),
                       scale=float(np.sqrt(2.0 / (PAIRS_DIM + FNN_HIDDEN))))
    p['pair_b1'] = jnp.zeros((1, FNN_HIDDEN), jnp.float32)
    p['pair_w2'] = nrm(ks[14], (FNN_HIDDEN, FNN_HIDDEN),
                       scale=float(np.sqrt(2.0 / (2 * FNN_HIDDEN))))
    p['pair_b2'] = jnp.zeros((1, FNN_HIDDEN), jnp.float32)
    p['pair_w3'] = nrm(ks[15], (FNN_HIDDEN, SENTIMENT_CLASS),
                       scale=float(np.sqrt(2.0 / (FNN_HIDDEN + SENTIMENT_CLASS))))
    p['pair_b3'] = jnp.zeros((1, SENTIMENT_CLASS), jnp.float32)
    return p


def prepare_params(p):
    """One-time weight preprocessing: fused block-diagonal LSTM weights with
    gate-interleaved columns, and lane-padded MLP weights (hidden 64->128,
    output 128 lanes with the softmax pad mask baked into b3)."""
    H = RNN_HIDDEN

    def interleave_gate_cols(wf, wb):
        parts = []
        for g in range(4):                            # [i,f,g,o]
            parts.append(wf[:, g * H:(g + 1) * H])
            parts.append(wb[:, g * H:(g + 1) * H])
        return jnp.concatenate(parts, axis=1)

    zih = jnp.zeros_like(p['lstm_wih_f'])
    zhh = jnp.zeros_like(p['lstm_whh_f'])
    w_ih_fused = jnp.concatenate(
        [interleave_gate_cols(p['lstm_wih_f'], zih),
         interleave_gate_cols(zih, p['lstm_wih_b'])], axis=0).astype(jnp.bfloat16)
    w_hh_fused = jnp.concatenate(
        [interleave_gate_cols(p['lstm_whh_f'], zhh),
         interleave_gate_cols(zhh, p['lstm_whh_b'])], axis=0).astype(jnp.bfloat16)
    b_fused = interleave_gate_cols(p['lstm_b_f'], p['lstm_b_b'])   # (1, 8H) f32

    def pad_mlp(w1, b1, w2, b2, w3, b3, n_class):
        hd = w1.shape[1]
        return dict(
            w1=jnp.pad(w1, ((0, 0), (0, _HID_LANES - hd))).astype(jnp.bfloat16),
            b1=jnp.pad(b1, ((0, 0), (0, _HID_LANES - hd))),
            w2=jnp.pad(w2, ((0, _HID_LANES - hd),
                            (0, _HID_LANES - hd))).astype(jnp.bfloat16),
            b2=jnp.pad(b2, ((0, 0), (0, _HID_LANES - hd))),
            w3=jnp.pad(w3, ((0, _HID_LANES - hd),
                            (0, _OUT_LANES - n_class))).astype(jnp.bfloat16),
            b3=jnp.concatenate(
                [b3, jnp.full((1, _OUT_LANES - n_class), _NEG_BIG, jnp.float32)],
                axis=1),
        )

    return {
        'emb': p['emb'],
        'postag_emb': p['postag_emb'],
        'lstm': dict(w_ih=w_ih_fused, w_hh=w_hh_fused, b=b_fused),
        'span_width_emb': p['span_width_emb'],
        'dist_emb3d': p['dist_emb'][:, None, :],      # (n_buckets, 1, Td)
        'span_mlp': pad_mlp(p['span_w1'], p['span_b1'], p['span_w2'],
                            p['span_b2'], p['span_w3'], p['span_b3'], CLASS_NUM),
        'pair_mlp': pad_mlp(p['pair_w1'], p['pair_b1'], p['pair_w2'],
                            p['pair_b2'], p['pair_w3'], p['pair_b3'],
                            SENTIMENT_CLASS),
    }


def _bucket(width):
    return max(ix for ix, v in enumerate(BUCKET_BINS) if width >= v)


# ----------------------------- forward pass -----------------------------
def synaste_forward(prep, tok, postag, length):
    B, L = tok.shape
    batch_max_seq_len = int(np.max(np.asarray(length)))
    assert batch_max_seq_len == L  # all sequences fully padded (pack_padded = id)

    # --- embeddings (tiny XLA gathers) ---
    word_embs = prep['emb'][tok]
    pos_embs = prep['postag_emb'][postag]
    embs = jnp.concatenate([word_embs, pos_embs], axis=-1).astype(jnp.float32)

    # --- fused BiLSTM encoder (one pallas_call, both directions) ---
    sent_out, Bp = bilstm(embs, prep['lstm'])          # (L*Bp, 2H) natural time

    # --- static span enumeration (Python) ---
    max_window = min(batch_max_seq_len, SPAN_MAX_LEN)
    span_indices = []
    for window in range(1, max_window + 1):
        for start in range(0, batch_max_seq_len - window + 1):
            span_indices.append((start, start + window))
    span_list = tuple((s, e, _bucket(abs(e - s))) for (s, e) in span_indices)
    S = len(span_indices)

    # --- fused span features + span_fnn + softmax ---
    spans_probability, spans_feat = span_forward(
        sent_out, prep['span_width_emb'], span_list, prep['span_mlp'], B, Bp)

    # --- pruned target / opinion (top-k, XLA) ---
    nz = int(batch_max_seq_len * SPAN_PRUNED_THRESHOLD)
    _, target_indices = jax.lax.top_k(spans_probability[:, :, 1], nz)   # aspect
    _, opinion_indices = jax.lax.top_k(spans_probability[:, :, 2], nz)  # opinion
    P = nz * nz

    # --- pair metadata (tiny int ops, XLA; indices go to SMEM via prefetch) ---
    starts = jnp.array([s for (s, _) in span_indices], dtype=jnp.int32)
    ends = jnp.array([e for (_, e) in span_indices], dtype=jnp.int32)
    tt = jnp.repeat(target_indices, nz, axis=1)        # (B, P) product order
    oo = jnp.tile(opinion_indices, (1, nz))
    a = starts[tt]
    b_ = ends[tt]
    c = starts[oo]
    d = ends[oo]
    dist = jnp.minimum(jnp.abs(b_ - c), jnp.abs(a - d))
    bins = jnp.array(BUCKET_BINS, dtype=jnp.int32)
    dist_bucket = (jnp.searchsorted(bins, dist, side='right') - 1).astype(jnp.int32)
    candidate_indices = jnp.stack([a, b_, c, d], axis=-1)        # (B, P, 4)
    meta = jnp.stack([tt.reshape(-1), oo.reshape(-1), dist_bucket.reshape(-1)],
                     axis=0).astype(jnp.int32)                   # (3, B*P)

    # --- fused pair features + pairs_fnn + softmax ---
    candidate_probability = pair_forward(
        spans_feat, prep['dist_emb3d'], meta, prep['pair_mlp'], B, P)

    return spans_probability, span_indices, candidate_probability, candidate_indices


# ----------------------------------- main -----------------------------------
if __name__ == "__main__":
    B, L = 2, 8
    key = jax.random.PRNGKey(0)
    k_param, k_tok, k_pos = jax.random.split(key, 3)

    params = init_params(k_param)
    prep = prepare_params(params)      # load-time weight fusion / lane padding

    tok = jax.random.randint(k_tok, (B, L), 1, TOK_SIZE, dtype=jnp.int32)
    postag = jax.random.randint(k_pos, (B, L), 1, POSTAG_SIZE, dtype=jnp.int32)
    length = np.full((B,), L, dtype=np.int32)

    spans_prob, span_indices, cand_prob, cand_idx = synaste_forward(
        prep, tok, postag, length)
    jax.block_until_ready((spans_prob, cand_prob, cand_idx))

    S = len(span_indices)
    nz = int(L * SPAN_PRUNED_THRESHOLD)
    assert spans_prob.shape == (B, S, CLASS_NUM)
    assert cand_prob.shape == (B, nz * nz, SENTIMENT_CLASS)
    assert cand_idx.shape == (B, nz * nz, 4)
    assert np.all(np.isfinite(np.asarray(spans_prob)))
    assert np.all(np.isfinite(np.asarray(cand_prob)))
    # exact softmax divide -> rows sum to 1 up to f32 rounding
    assert np.allclose(np.sum(np.asarray(spans_prob), axis=-1), 1.0, atol=1e-3)
    assert np.allclose(np.sum(np.asarray(cand_prob), axis=-1), 1.0, atol=1e-3)
    print("KERNEL_OK")
</pallas_src>

<mosaic_0001>
module attributes {stable_mosaic.version = 11 : i64} {
  func.func @bilstm_fused_kernel(%arg0: i32, %arg1: memref<64x96xbf16, #tpu.memory_space<vmem>>, %arg2: memref<96x256xbf16, #tpu.memory_space<vmem>>, %arg3: memref<64x256xbf16, #tpu.memory_space<vmem>>, %arg4: memref<1x256xf32, #tpu.memory_space<vmem>>, %arg5: memref<64x64xf32, #tpu.memory_space<vmem>>) attributes {dimension_semantics = [#tpu.dimension_semantics<arbitrary>], iteration_bounds = array<i64: 1>, scalar_prefetch = 0 : i64, scratch_operands = 0 : i64, tpu.core_type = #tpu.core_type<tc>, window_params = [{pipeline_mode = #tpu.pipeline_mode<synchronous>, transform_indices = @transform_0, window_bounds = array<i64: 64, 96>}, {pipeline_mode = #tpu.pipeline_mode<synchronous>, transform_indices = @transform_1, window_bounds = array<i64: 96, 256>}, {pipeline_mode = #tpu.pipeline_mode<synchronous>, transform_indices = @transform_2, window_bounds = array<i64: 64, 256>}, {pipeline_mode = #tpu.pipeline_mode<synchronous>, transform_indices = @transform_3, window_bounds = array<i64: 1, 256>}, {pipeline_mode = #tpu.pipeline_mode<synchronous>, transform_indices = @transform_4, window_bounds = array<i64: 64, 64>}]} {
    %c0 = arith.constant 0 : index
    %c0_0 = arith.constant 0 : index
    %0 = vector.load %arg1[%c0, %c0_0] : memref<64x96xbf16, #tpu.memory_space<vmem>>, vector<64x96xbf16>
    %c0_1 = arith.constant 0 : index
    %c0_2 = arith.constant 0 : index
    %1 = vector.load %arg2[%c0_1, %c0_2] : memref<96x256xbf16, #tpu.memory_space<vmem>>, vector<96x256xbf16>
    %cst = arith.constant dense<0.000000e+00> : vector<64x256xf32>
    %2 = tpu.matmul %0, %1, %cst {dimension_numbers = #tpu.dot_dimension_numbers<[1], [0], [0], [1], [0, 0, 1, 1], [], []>} : vector<64x96xbf16>, vector<96x256xbf16>, vector<64x256xf32> -> vector<64x256xf32>
    %c0_3 = arith.constant 0 : index
    %c0_4 = arith.constant 0 : index
    %3 = vector.load %arg4[%c0_3, %c0_4] : memref<1x256xf32, #tpu.memory_space<vmem>>, vector<1x256xf32>
    %4 = vector.broadcast %3 : vector<1x256xf32> to vector<64x256xf32>
    %5 = arith.addf %2, %4 : vector<64x256xf32>
    %c0_5 = arith.constant 0 : index
    %c0_6 = arith.constant 0 : index
    %6 = vector.load %arg3[%c0_5, %c0_6] : memref<64x256xbf16, #tpu.memory_space<vmem>>, vector<64x256xbf16>
    %cst_7 = arith.constant 0.000000e+00 : f32
    %7 = vector.broadcast %cst_7 : f32 to vector<8x64xf32>
    %cst_8 = arith.constant 0.000000e+00 : f32
    %8 = vector.broadcast %cst_8 : f32 to vector<8x64xf32>
    %9 = vector.extract_strided_slice %5 {offsets = [0, 0], sizes = [8, 256], strides = [1, 1]} : vector<64x256xf32> to vector<8x256xf32>
    %10 = arith.truncf %7 : vector<8x64xf32> to vector<8x64xbf16>
    %cst_9 = arith.constant dense<0.000000e+00> : vector<8x256xf32>
    %11 = tpu.matmul %10, %6, %cst_9 {dimension_numbers = #tpu.dot_dimension_numbers<[1], [0], [0], [1], [0, 0, 1, 1], [], []>} : vector<8x64xbf16>, vector<64x256xbf16>, vector<8x256xf32> -> vector<8x256xf32>
    %12 = arith.addf %9, %11 : vector<8x256xf32>
    %13 = arith.negf %12 : vector<8x256xf32>
    %14 = math.exp %13 : vector<8x256xf32>
    %cst_10 = arith.constant 1.000000e+00 : f32
    %15 = vector.broadcast %cst_10 : f32 to vector<8x256xf32>
    %16 = arith.addf %15, %14 : vector<8x256xf32>
    %17 = arith.divf %15, %16 : vector<8x256xf32>
    %18 = math.tanh %12 : vector<8x256xf32>
    %19 = vector.extract_strided_slice %17 {offsets = [0, 0], sizes = [8, 64], strides = [1, 1]} : vector<8x256xf32> to vector<8x64xf32>
    %20 = vector.extract_strided_slice %17 {offsets = [0, 64], sizes = [8, 64], strides = [1, 1]} : vector<8x256xf32> to vector<8x64xf32>
    %21 = vector.extract_strided_slice %18 {offsets = [0, 128], sizes = [8, 64], strides = [1, 1]} : vector<8x256xf32> to vector<8x64xf32>
    %22 = vector.extract_strided_slice %17 {offsets = [0, 192], sizes = [8, 64], strides = [1, 1]} : vector<8x256xf32> to vector<8x64xf32>
    %23 = arith.mulf %20, %8 : vector<8x64xf32>
    %24 = arith.mulf %19, %21 : vector<8x64xf32>
    %25 = arith.addf %23, %24 : vector<8x64xf32>
    %26 = math.tanh %25 : vector<8x64xf32>
    %27 = arith.mulf %22, %26 : vector<8x64xf32>
    %28 = vector.extract_strided_slice %27 {offsets = [0, 0], sizes = [8, 32], strides = [1, 1]} : vector<8x64xf32> to vector<8x32xf32>
    %c0_11 = arith.constant 0 : index
    %c0_12 = arith.constant 0 : index
    %29 = vector.load %arg5[%c0_11, %c0_12] : memref<64x64xf32, #tpu.memory_space<vmem>>, vector<8x32xf32>
    tpu.vector_store %arg5[%c0_11, %c0_12], %28 {strides = array<i32>} : memref<64x64xf32, #tpu.memory_space<vmem>>, vector<8x32xf32>,
    %30 = vector.extract_strided_slice %27 {offsets = [0, 32], sizes = [8, 32], strides = [1, 1]} : vector<8x64xf32> to vector<8x32xf32>
    %c56 = arith.constant 56 : index
    %c32 = arith.constant 32 : index
    %31 = vector.load %arg5[%c56, %c32] : memref<64x64xf32, #tpu.memory_space<vmem>>, vector<8x32xf32>
    tpu.vector_store %arg5[%c56, %c32], %30 {strides = array<i32>} : memref<64x64xf32, #tpu.memory_space<vmem>>, vector<8x32xf32>,
    %32 = vector.extract_strided_slice %5 {offsets = [8, 0], sizes = [8, 256], strides = [1, 1]} : vector<64x256xf32> to vector<8x256xf32>
    %33 = arith.truncf %27 : vector<8x64xf32> to vector<8x64xbf16>
    %cst_13 = arith.constant dense<0.000000e+00> : vector<8x256xf32>
    %34 = tpu.matmul %33, %6, %cst_13 {dimension_numbers = #tpu.dot_dimension_numbers<[1], [0], [0], [1], [0, 0, 1, 1], [], []>} : vector<8x64xbf16>, vector<64x256xbf16>, vector<8x256xf32> -> vector<8x256xf32>
    %35 = arith.addf %32, %34 : vector<8x256xf32>
    %36 = arith.negf %35 : vector<8x256xf32>
    %37 = math.exp %36 : vector<8x256xf32>
    %cst_14 = arith.constant 1.000000e+00 : f32
    %38 = vector.broadcast %cst_14 : f32 to vector<8x256xf32>
    %39 = arith.addf %38, %37 : vector<8x256xf32>
    %40 = arith.divf %38, %39 : vector<8x256xf32>
    %41 = math.tanh %35 : vector<8x256xf32>
    %42 = vector.extract_strided_slice %40 {offsets = [0, 0], sizes = [8, 64], strides = [1, 1]} : vector<8x256xf32> to vector<8x64xf32>
    %43 = vector.extract_strided_slice %40 {offsets = [0, 64], sizes = [8, 64], strides = [1, 1]} : vector<8x256xf32> to vector<8x64xf32>
    %44 = vector.extract_strided_slice %41 {offsets = [0, 128], sizes = [8, 64], strides = [1, 1]} : vector<8x256xf32> to vector<8x64xf32>
    %45 = vector.extract_strided_slice %40 {offsets = [0, 192], sizes = [8, 64], strides = [1, 1]} : vector<8x256xf32> to vector<8x64xf32>
    %46 = arith.mulf %43, %25 : vector<8x64xf32>
    %47 = arith.mulf %42, %44 : vector<8x64xf32>
    %48 = arith.addf %46, %47 : vector<8x64xf32>
    %49 = math.tanh %48 : vector<8x64xf32>
    %50 = arith.mulf %45, %49 : vector<8x64xf32>
    %51 = vector.extract_strided_slice %50 {offsets = [0, 0], sizes = [8, 32], strides = [1, 1]} : vector<8x64xf32> to vector<8x32xf32>
    %c8 = arith.constant 8 : index
    %c0_15 = arith.constant 0 : index
    %52 = vector.load %arg5[%c8, %c0_15] : memref<64x64xf32, #tpu.memory_space<vmem>>, vector<8x32xf32>
    tpu.vector_store %arg5[%c8, %c0_15], %51 {strides = array<i32>} : memref<64x64xf32, #tpu.memory_space<vmem>>, vector<8x32xf32>,
    %53 = vector.extract_strided_slice %50 {offsets = [0, 32], sizes = [8, 32], strides = [1, 1]} : vector<8x64xf32> to vector<8x32xf32>
    %c48 = arith.constant 48 : index
    %c32_16 = arith.constant 32 : index
    %54 = vector.load %arg5[%c48, %c32_16] : memref<64x64xf32, #tpu.memory_space<vmem>>, vector<8x32xf32>
    tpu.vector_store %arg5[%c48, %c32_16], %53 {strides = array<i32>} : memref<64x64xf32, #tpu.memory_space<vmem>>, vector<8x32xf32>,
    %55 = vector.extract_strided_slice %5 {offsets = [16, 0], sizes = [8, 256], strides = [1, 1]} : vector<64x256xf32> to vector<8x256xf32>
    %56 = arith.truncf %50 : vector<8x64xf32> to vector<8x64xbf16>
    %cst_17 = arith.constant dense<0.000000e+00> : vector<8x256xf32>
    %57 = tpu.matmul %56, %6, %cst_17 {dimension_numbers = #tpu.dot_dimension_numbers<[1], [0], [0], [1], [0, 0, 1, 1], [], []>} : vector<8x64xbf16>, vector<64x256xbf16>, vector<8x256xf32> -> vector<8x256xf32>
    %58 = arith.addf %55, %57 : vector<8x256xf32>
    %59 = arith.negf %58 : vector<8x256xf32>
    %60 = math.exp %59 : vector<8x256xf32>
    %cst_18 = arith.constant 1.000000e+00 : f32
    %61 = vector.broadcast %cst_18 : f32 to vector<8x256xf32>
    %62 = arith.addf %61, %60 : vector<8x256xf32>
    %63 = arith.divf %61, %62 : vector<8x256xf32>
    %64 = math.tanh %58 : vector<8x256xf32>
    %65 = vector.extract_strided_slice %63 {offsets = [0, 0], sizes = [8, 64], strides = [1, 1]} : vector<8x256xf32> to vector<8x64xf32>
    %66 = vector.extract_strided_slice %63 {offsets = [0, 64], sizes = [8, 64], strides = [1, 1]} : vector<8x256xf32> to vector<8x64xf32>
    %67 = vector.extract_strided_slice %64 {offsets = [0, 128], sizes = [8, 64], strides = [1, 1]} : vector<8x256xf32> to vector<8x64xf32>
    %68 = vector.extract_strided_slice %63 {offsets = [0, 192], sizes = [8, 64], strides = [1, 1]} : vector<8x256xf32> to vector<8x64xf32>
    %69 = arith.mulf %66, %48 : vector<8x64xf32>
    %70 = arith.mulf %65, %67 : vector<8x64xf32>
    %71 = arith.addf %69, %70 : vector<8x64xf32>
    %72 = math.tanh %71 : vector<8x64xf32>
    %73 = arith.mulf %68, %72 : vector<8x64xf32>
    %74 = vector.extract_strided_slice %73 {offsets = [0, 0], sizes = [8, 32], strides = [1, 1]} : vector<8x64xf32> to vector<8x32xf32>
    %c16 = arith.constant 16 : index
    %c0_19 = arith.constant 0 : index
    %75 = vector.load %arg5[%c16, %c0_19] : memref<64x64xf32, #tpu.memory_space<vmem>>, vector<8x32xf32>
    tpu.vector_store %arg5[%c16, %c0_19], %74 {strides = array<i32>} : memref<64x64xf32, #tpu.memory_space<vmem>>, vector<8x32xf32>,
    %76 = vector.extract_strided_slice %73 {offsets = [0, 32], sizes = [8, 32], strides = [1, 1]} : vector<8x64xf32> to vector<8x32xf32>
    %c40 = arith.constant 40 : index
    %c32_20 = arith.constant 32 : index
    %77 = vector.load %arg5[%c40, %c32_20] : memref<64x64xf32, #tpu.memory_space<vmem>>, vector<8x32xf32>
    tpu.vector_store %arg5[%c40, %c32_20], %76 {strides = array<i32>} : memref<64x64xf32, #tpu.memory_space<vmem>>, vector<8x32xf32>,
    %78 = vector.extract_strided_slice %5 {offsets = [24, 0], sizes = [8, 256], strides = [1, 1]} : vector<64x256xf32> to vector<8x256xf32>
    %79 = arith.truncf %73 : vector<8x64xf32> to vector<8x64xbf16>
    %cst_21 = arith.constant dense<0.000000e+00> : vector<8x256xf32>
    %80 = tpu.matmul %79, %6, %cst_21 {dimension_numbers = #tpu.dot_dimension_numbers<[1], [0], [0], [1], [0, 0, 1, 1], [], []>} : vector<8x64xbf16>, vector<64x256xbf16>, vector<8x256xf32> -> vector<8x256xf32>
    %81 = arith.addf %78, %80 : vector<8x256xf32>
    %82 = arith.negf %81 : vector<8x256xf32>
    %83 = math.exp %82 : vector<8x256xf32>
    %cst_22 = arith.constant 1.000000e+00 : f32
    %84 = vector.broadcast %cst_22 : f32 to vector<8x256xf32>
    %85 = arith.addf %84, %83 : vector<8x256xf32>
    %86 = arith.divf %84, %85 : vector<8x256xf32>
    %87 = math.tanh %81 : vector<8x256xf32>
    %88 = vector.extract_strided_slice %86 {offsets = [0, 0], sizes = [8, 64], strides = [1, 1]} : vector<8x256xf32> to vector<8x64xf32>
    %89 = vector.extract_strided_slice %86 {offsets = [0, 64], sizes = [8, 64], strides = [1, 1]} : vector<8x256xf32> to vector<8x64xf32>
    %90 = vector.extract_strided_slice %87 {offsets = [0, 128], sizes = [8, 64], strides = [1, 1]} : vector<8x256xf32> to vector<8x64xf32>
    %91 = vector.extract_strided_slice %86 {offsets = [0, 192], sizes = [8, 64], strides = [1, 1]} : vector<8x256xf32> to vector<8x64xf32>
    %92 = arith.mulf %89, %71 : vector<8x64xf32>
    %93 = arith.mulf %88, %90 : vector<8x64xf32>
    %94 = arith.addf %92, %93 : vector<8x64xf32>
    %95 = math.tanh %94 : vector<8x64xf32>
    %96 = arith.mulf %91, %95 : vector<8x64xf32>
    %97 = vector.extract_strided_slice %96 {offsets = [0, 0], sizes = [8, 32], strides = [1, 1]} : vector<8x64xf32> to vector<8x32xf32>
    %c24 = arith.constant 24 : index
    %c0_23 = arith.constant 0 : index
    %98 = vector.load %arg5[%c24, %c0_23] : memref<64x64xf32, #tpu.memory_space<vmem>>, vector<8x32xf32>
    tpu.vector_store %arg5[%c24, %c0_23], %97 {strides = array<i32>} : memref<64x64xf32, #tpu.memory_space<vmem>>, vector<8x32xf32>,
    %99 = vector.extract_strided_slice %96 {offsets = [0, 32], sizes = [8, 32], strides = [1, 1]} : vector<8x64xf32> to vector<8x32xf32>
    %c32_24 = arith.constant 32 : index
    %c32_25 = arith.constant 32 : index
    %100 = vector.load %arg5[%c32_24, %c32_25] : memref<64x64xf32, #tpu.memory_space<vmem>>, vector<8x32xf32>
    tpu.vector_store %arg5[%c32_24, %c32_25], %99 {strides = array<i32>} : memref<64x64xf32, #tpu.memory_space<vmem>>, vector<8x32xf32>,
    %101 = vector.extract_strided_slice %5 {offsets = [32, 0], sizes = [8, 256], strides = [1, 1]} : vector<64x256xf32> to vector<8x256xf32>
    %102 = arith.truncf %96 : vector<8x64xf32> to vector<8x64xbf16>
    %cst_26 = arith.constant dense<0.000000e+00> : vector<8x256xf32>
    %103 = tpu.matmul %102, %6, %cst_26 {dimension_numbers = #tpu.dot_dimension_numbers<[1], [0], [0], [1], [0, 0, 1, 1], [], []>} : vector<8x64xbf16>, vector<64x256xbf16>, vector<8x256xf32> -> vector<8x256xf32>
    %104 = arith.addf %101, %103 : vector<8x256xf32>
    %105 = arith.negf %104 : vector<8x256xf32>
    %106 = math.exp %105 : vector<8x256xf32>
    %cst_27 = arith.constant 1.000000e+00 : f32
    %107 = vector.broadcast %cst_27 : f32 to vector<8x256xf32>
    %108 = arith.addf %107, %106 : vector<8x256xf32>
    %109 = arith.divf %107, %108 : vector<8x256xf32>
    %110 = math.tanh %104 : vector<8x256xf32>
    %111 = vector.extract_strided_slice %109 {offsets = [0, 0], sizes = [8, 64], strides = [1, 1]} : vector<8x256xf32> to vector<8x64xf32>
    %112 = vector.extract_strided_slice %109 {offsets = [0, 64], sizes = [8, 64], strides = [1, 1]} : vector<8x256xf32> to vector<8x64xf32>
    %113 = vector.extract_strided_slice %110 {offsets = [0, 128], sizes = [8, 64], strides = [1, 1]} : vector<8x256xf32> to vector<8x64xf32>
    %114 = vector.extract_strided_slice %109 {offsets = [0, 192], sizes = [8, 64], strides = [1, 1]} : vector<8x256xf32> to vector<8x64xf32>
    %115 = arith.mulf %112, %94 : vector<8x64xf32>
    %116 = arith.mulf %111, %113 : vector<8x64xf32>
    %117 = arith.addf %115, %116 : vector<8x64xf32>
    %118 = math.tanh %117 : vector<8x64xf32>
    %119 = arith.mulf %114, %118 : vector<8x64xf32>
    %120 = vector.extract_strided_slice %119 {offsets = [0, 0], sizes = [8, 32], strides = [1, 1]} : vector<8x64xf32> to vector<8x32xf32>
    %c32_28 = arith.constant 32 : index
    %c0_29 = arith.constant 0 : index
    %121 = vector.load %arg5[%c32_28, %c0_29] : memref<64x64xf32, #tpu.memory_space<vmem>>, vector<8x32xf32>
    tpu.vector_store %arg5[%c32_28, %c0_29], %120 {strides = array<i32>} : memref<64x64xf32, #tpu.memory_space<vmem>>, vector<8x32xf32>,
    %122 = vector.extract_strided_slice %119 {offsets = [0, 32], sizes = [8, 32], strides = [1, 1]} : vector<8x64xf32> to vector<8x32xf32>
    %c24_30 = arith.constant 24 : index
    %c32_31 = arith.constant 32 : index
    %123 = vector.load %arg5[%c24_30, %c32_31] : memref<64x64xf32, #tpu.memory_space<vmem>>, vector<8x32xf32>
    tpu.vector_store %arg5[%c24_30, %c32_31], %122 {strides = array<i32>} : memref<64x64xf32, #tpu.memory_space<vmem>>, vector<8x32xf32>,
    %124 = vector.extract_strided_slice %5 {offsets = [40, 0], sizes = [8, 256], strides = [1, 1]} : vector<64x256xf32> to vector<8x256xf32>
    %125 = arith.truncf %119 : vector<8x64xf32> to vector<8x64xbf16>
    %cst_32 = arith.constant dense<0.000000e+00> : vector<8x256xf32>
    %126 = tpu.matmul %125, %6, %cst_32 {dimension_numbers = #tpu.dot_dimension_numbers<[1], [0], [0], [1], [0, 0, 1, 1], [], []>} : vector<8x64xbf16>, vector<64x256xbf16>, vector<8x256xf32> -> vector<8x256xf32>
    %127 = arith.addf %124, %126 : vector<8x256xf32>
    %128 = arith.negf %127 : vector<8x256xf32>
    %129 = math.exp %128 : vector<8x256xf32>
    %cst_33 = arith.constant 1.000000e+00 : f32
    %130 = vector.broadcast %cst_33 : f32 to vector<8x256xf32>
    %131 = arith.addf %130, %129 : vector<8x256xf32>
    %132 = arith.divf %130, %131 : vector<8x256xf32>
    %133 = math.tanh %127 : vector<8x256xf32>
    %134 = vector.extract_strided_slice %132 {offsets = [0, 0], sizes = [8, 64], strides = [1, 1]} : vector<8x256xf32> to vector<8x64xf32>
    %135 = vector.extract_strided_slice %132 {offsets = [0, 64], sizes = [8, 64], strides = [1, 1]} : vector<8x256xf32> to vector<8x64xf32>
    %136 = vector.extract_strided_slice %133 {offsets = [0, 128], sizes = [8, 64], strides = [1, 1]} : vector<8x256xf32> to vector<8x64xf32>
    %137 = vector.extract_strided_slice %132 {offsets = [0, 192], sizes = [8, 64], strides = [1, 1]} : vector<8x256xf32> to vector<8x64xf32>
    %138 = arith.mulf %135, %117 : vector<8x64xf32>
    %139 = arith.mulf %134, %136 : vector<8x64xf32>
    %140 = arith.addf %138, %139 : vector<8x64xf32>
    %141 = math.tanh %140 : vector<8x64xf32>
    %142 = arith.mulf %137, %141 : vector<8x64xf32>
    %143 = vector.extract_strided_slice %142 {offsets = [0, 0], sizes = [8, 32], strides = [1, 1]} : vector<8x64xf32> to vector<8x32xf32>
    %c40_34 = arith.constant 40 : index
    %c0_35 = arith.constant 0 : index
    %144 = vector.load %arg5[%c40_34, %c0_35] : memref<64x64xf32, #tpu.memory_space<vmem>>, vector<8x32xf32>
    tpu.vector_store %arg5[%c40_34, %c0_35], %143 {strides = array<i32>} : memref<64x64xf32, #tpu.memory_space<vmem>>, vector<8x32xf32>,
    %145 = vector.extract_strided_slice %142 {offsets = [0, 32], sizes = [8, 32], strides = [1, 1]} : vector<8x64xf32> to vector<8x32xf32>
    %c16_36 = arith.constant 16 : index
    %c32_37 = arith.constant 32 : index
    %146 = vector.load %arg5[%c16_36, %c32_37] : memref<64x64xf32, #tpu.memory_space<vmem>>, vector<8x32xf32>
    tpu.vector_store %arg5[%c16_36, %c32_37], %145 {strides = array<i32>} : memref<64x64xf32, #tpu.memory_space<vmem>>, vector<8x32xf32>,
    %147 = vector.extract_strided_slice %5 {offsets = [48, 0], sizes = [8, 256], strides = [1, 1]} : vector<64x256xf32> to vector<8x256xf32>
    %148 = arith.truncf %142 : vector<8x64xf32> to vector<8x64xbf16>
    %cst_38 = arith.constant dense<0.000000e+00> : vector<8x256xf32>
    %149 = tpu.matmul %148, %6, %cst_38 {dimension_numbers = #tpu.dot_dimension_numbers<[1], [0], [0], [1], [0, 0, 1, 1], [], []>} : vector<8x64xbf16>, vector<64x256xbf16>, vector<8x256xf32> -> vector<8x256xf32>
    %150 = arith.addf %147, %149 : vector<8x256xf32>
    %151 = arith.negf %150 : vector<8x256xf32>
    %152 = math.exp %151 : vector<8x256xf32>
    %cst_39 = arith.constant 1.000000e+00 : f32
    %153 = vector.broadcast %cst_39 : f32 to vector<8x256xf32>
    %154 = arith.addf %153, %152 : vector<8x256xf32>
    %155 = arith.divf %153, %154 : vector<8x256xf32>
    %156 = math.tanh %150 : vector<8x256xf32>
    %157 = vector.extract_strided_slice %155 {offsets = [0, 0], sizes = [8, 64], strides = [1, 1]} : vector<8x256xf32> to vector<8x64xf32>
    %158 = vector.extract_strided_slice %155 {offsets = [0, 64], sizes = [8, 64], strides = [1, 1]} : vector<8x256xf32> to vector<8x64xf32>
    %159 = vector.extract_strided_slice %156 {offsets = [0, 128], sizes = [8, 64], strides = [1, 1]} : vector<8x256xf32> to vector<8x64xf32>
    %160 = vector.extract_strided_slice %155 {offsets = [0, 192], sizes = [8, 64], strides = [1, 1]} : vector<8x256xf32> to vector<8x64xf32>
    %161 = arith.mulf %158, %140 : vector<8x64xf32>
    %162 = arith.mulf %157, %159 : vector<8x64xf32>
    %163 = arith.addf %161, %162 : vector<8x64xf32>
    %164 = math.tanh %163 : vector<8x64xf32>
    %165 = arith.mulf %160, %164 : vector<8x64xf32>
    %166 = vector.extract_strided_slice %165 {offsets = [0, 0], sizes = [8, 32], strides = [1, 1]} : vector<8x64xf32> to vector<8x32xf32>
    %c48_40 = arith.constant 48 : index
    %c0_41 = arith.constant 0 : index
    %167 = vector.load %arg5[%c48_40, %c0_41] : memref<64x64xf32, #tpu.memory_space<vmem>>, vector<8x32xf32>
    tpu.vector_store %arg5[%c48_40, %c0_41], %166 {strides = array<i32>} : memref<64x64xf32, #tpu.memory_space<vmem>>, vector<8x32xf32>,
    %168 = vector.extract_strided_slice %165 {offsets = [0, 32], sizes = [8, 32], strides = [1, 1]} : vector<8x64xf32> to vector<8x32xf32>
    %c8_42 = arith.constant 8 : index
    %c32_43 = arith.constant 32 : index
    %169 = vector.load %arg5[%c8_42, %c32_43] : memref<64x64xf32, #tpu.memory_space<vmem>>, vector<8x32xf32>
    tpu.vector_store %arg5[%c8_42, %c32_43], %168 {strides = array<i32>} : memref<64x64xf32, #tpu.memory_space<vmem>>, vector<8x32xf32>,
    %170 = vector.extract_strided_slice %5 {offsets = [56, 0], sizes = [8, 256], strides = [1, 1]} : vector<64x256xf32> to vector<8x256xf32>
    %171 = arith.truncf %165 : vector<8x64xf32> to vector<8x64xbf16>
    %cst_44 = arith.constant dense<0.000000e+00> : vector<8x256xf32>
    %172 = tpu.matmul %171, %6, %cst_44 {dimension_numbers = #tpu.dot_dimension_numbers<[1], [0], [0], [1], [0, 0, 1, 1], [], []>} : vector<8x64xbf16>, vector<64x256xbf16>, vector<8x256xf32> -> vector<8x256xf32>
    %173 = arith.addf %170, %172 : vector<8x256xf32>
    %174 = arith.negf %173 : vector<8x256xf32>
    %175 = math.exp %174 : vector<8x256xf32>
    %cst_45 = arith.constant 1.000000e+00 : f32
    %176 = vector.broadcast %cst_45 : f32 to vector<8x256xf32>
    %177 = arith.addf %176, %175 : vector<8x256xf32>
    %178 = arith.divf %176, %177 : vector<8x256xf32>
    %179 = math.tanh %173 : vector<8x256xf32>
    %180 = vector.extract_strided_slice %178 {offsets = [0, 0], sizes = [8, 64], strides = [1, 1]} : vector<8x256xf32> to vector<8x64xf32>
    %181 = vector.extract_strided_slice %178 {offsets = [0, 64], sizes = [8, 64], strides = [1, 1]} : vector<8x256xf32> to vector<8x64xf32>
    %182 = vector.extract_strided_slice %179 {offsets = [0, 128], sizes = [8, 64], strides = [1, 1]} : vector<8x256xf32> to vector<8x64xf32>
    %183 = vector.extract_strided_slice %178 {offsets = [0, 192], sizes = [8, 64], strides = [1, 1]} : vector<8x256xf32> to vector<8x64xf32>
    %184 = arith.mulf %181, %163 : vector<8x64xf32>
    %185 = arith.mulf %180, %182 : vector<8x64xf32>
    %186 = arith.addf %184, %185 : vector<8x64xf32>
    %187 = math.tanh %186 : vector<8x64xf32>
    %188 = arith.mulf %183, %187 : vector<8x64xf32>
    %189 = vector.extract_strided_slice %188 {offsets = [0, 0], sizes = [8, 32], strides = [1, 1]} : vector<8x64xf32> to vector<8x32xf32>
    %c56_46 = arith.constant 56 : index
    %c0_47 = arith.constant 0 : index
    %190 = vector.load %arg5[%c56_46, %c0_47] : memref<64x64xf32, #tpu.memory_space<vmem>>, vector<8x32xf32>
    tpu.vector_store %arg5[%c56_46, %c0_47], %189 {strides = array<i32>} : memref<64x64xf32, #tpu.memory_space<vmem>>, vector<8x32xf32>,
    %191 = vector.extract_strided_slice %188 {offsets = [0, 32], sizes = [8, 32], strides = [1, 1]} : vector<8x64xf32> to vector<8x32xf32>
    %c0_48 = arith.constant 0 : index
    %c32_49 = arith.constant 32 : index
    %192 = vector.load %arg5[%c0_48, %c32_49] : memref<64x64xf32, #tpu.memory_space<vmem>>, vector<8x32xf32>
    tpu.vector_store %arg5[%c0_48, %c32_49], %191 {strides = array<i32>} : memref<64x64xf32, #tpu.memory_space<vmem>>, vector<8x32xf32>,
    return
  }
  func.func @transform_0(%arg0: i32) -> (i32, i32) {
    %c0_i32 = arith.constant 0 : i32
    %c0_i32_0 = arith.constant 0 : i32
    %c0_i32_1 = arith.constant 0 : i32
    return %c0_i32, %c0_i32_0 : i32, i32
  }
  func.func @transform_1(%arg0: i32) -> (i32, i32) {
    %c0_i32 = arith.constant 0 : i32
    %c0_i32_0 = arith.constant 0 : i32
    %c0_i32_1 = arith.constant 0 : i32
    return %c0_i32, %c0_i32_0 : i32, i32
  }
  func.func @transform_2(%arg0: i32) -> (i32, i32) {
    %c0_i32 = arith.constant 0 : i32
    %c0_i32_0 = arith.constant 0 : i32
    %c0_i32_1 = arith.constant 0 : i32
    return %c0_i32, %c0_i32_0 : i32, i32
  }
  func.func @transform_3(%arg0: i32) -> (i32, i32) {
    %c0_i32 = arith.constant 0 : i32
    %c0_i32_0 = arith.constant 0 : i32
    %c0_i32_1 = arith.constant 0 : i32
    return %c0_i32, %c0_i32_0 : i32, i32
  }
  func.func @transform_4(%arg0: i32) -> (i32, i32) {
    %c0_i32 = arith.constant 0 : i32
    %c0_i32_0 = arith.constant 0 : i32
    %c0_i32_1 = arith.constant 0 : i32
    return %c0_i32, %c0_i32_0 : i32, i32
  }
}

</mosaic_0001>

<bundles_post_ra>
// kernel: tpu_custom_call.1
= control target key start
LH: loop header
LB: loop body
LE: loop exit
PB: predicated region body
PF: predicated region fallthrough
CT: control target
= control target key end

     0   :  { %9 = vsyncpa [#allocation3], 0  ;;  %s1674_s0 = inlined_call_operand.hbm [shape: bf16[64,96], index: 0, kind: input, shape index: {}]   ;;  %s1675_s1 = inlined_call_operand.hbm [shape: bf16[96,256], index: 1, kind: input, shape index: {}]   ;;  %s1676_s2 = inlined_call_operand.hbm [shape: bf16[64,256], index: 2, kind: input, shape index: {}]   ;;  %s1677_s3 = inlined_call_operand.vmem [shape: f32[1,256], index: 3, kind: input, shape index: {}]   ;;  %s1678_s4 = inlined_call_operand.hbm [shape: f32[64,64], index: 4, kind: output, shape index: {}]  }
   0x1   :  { %10 = vsyncpa [#allocation6], 0  ;;  %s29_s17 = sshll.u32 %s1675_s1, 4  ;;  %s30_s17 = int_to_ptr.hbm [resolvable:$true] %s29_s17 }
   0x2   :  { %11 = vsyncpa [#allocation4], 0  ;;  %s1387_s18 = smov [#allocation5]   ;;  %s16_s22 = sshll.u32 %s1674_s0, 4  ;;  %s17_s22 = int_to_ptr.hbm [resolvable:$true] %s16_s22 }
   0x3   :  { %s31_s19 = sshll.u32 %s1387_s18, 4  ;;  %s1388_s23 = smov 128   ;;  %s32_s19 = int_to_ptr.vmem [resolvable:$true] %s31_s19 }
   0x4   :  { %s1389_s24 = smov 8   ;;  %s1390_s25 = smov [#allocation2]  }
   0x5   :  { %37 = dma.hbm_to_vmem [thread:$0]  %s30_s17, 1536, %s32_s19, [#allocation6], %s1388_s23, %s1388_s23, %s1389_s24  }
   0x6   :  { %s18_s26 = sshll.u32 %s1390_s25, 4  ;;  %s1391_s1 = smov 64   ;;  %s19_s26 = int_to_ptr.vmem [resolvable:$true] %s18_s26 }
   0x7   :  { %s1392_s27 = smov 4   ;;  %s42_s30 = sshll.u32 %s1676_s2, 4  ;;  %s43_s30 = int_to_ptr.hbm [resolvable:$true] %s42_s30 }
   0x8   :  { %24 = dma.hbm_to_vmem [thread:$0]  %s17_s22, 512, %s19_s26, [#allocation3], %s1391_s1, %s1391_s1, %s1392_s27  }
   0x9   :  { %s1393_s0 = smov [#allocation7]  }
   0xa   :  { %s44_s5 = sshll.u32 %s1393_s0, 4  ;;  %s45_s5 = int_to_ptr.vmem [resolvable:$true] %s44_s5 }
   0xb   :  { %50 = dma.hbm_to_vmem [thread:$0]  %s43_s30, 1024, %s45_s5, [#allocation6], %s1388_s23, %s1388_s23, %s1389_s24  }
   0xc   :  { %1381 = dma.done.wait [#allocation3], 512  }
   0xd   :  { %1382 = vsyncadd [#allocation3], 4294966784 }
   0xe   :  { %1383 = dma.done.wait [#allocation6], 2560  }
   0xf   :  { %1384 = vsyncadd [#allocation6], 4294964736  ;;  %v1080_v0 = vld [vmem:[#allocation5 + $0x50] sm:$0xf]  ;;  %v1171_v1 = vld [vmem:[#allocation5 + $0x54] sm:$0xf0] }
  0x10   :  { %v1120_v2 = vld [vmem:[#allocation7 + $0x30] sm:$0xf]  ;;  %v1081_v3 = vor.u32 %v1171_v1, %v1080_v0  ;;  %v1179_v4 = vld [vmem:[#allocation7 + $0x34] sm:$0xf0]  ;;  %v1072_v5 = vld [vmem:[#allocation5 + $0x40] sm:$0xf] }
  0x11   :  { %v1169_v6 = vld [vmem:[#allocation5 + $0x44] sm:$0xf0]  ;;  %v1438_v7 = vor.u32 %v1179_v4, %v1120_v2  ;;  %v1112_v8 = vld [vmem:[#allocation7 + $0x20] sm:$0xf]  ;;  %v1170_v11 = vld [vmem:[#allocation5 + $0x54] sm:$0xf] }
  0x12   :  { %v1177_v9 = vld [vmem:[#allocation7 + $0x24] sm:$0xf0]  ;;  %187 = vmatpush.bf16.msra.mxu0 %v1081_v3  ;;  %v1073_v10 = vor.u32 %v1169_v6, %v1072_v5  ;;  %v1082_v12 = vld [vmem:[#allocation5 + $0x58] sm:$0xf0]  ;;  %v1064_v14 = vld [vmem:[#allocation5 + $0x30] sm:$0xf] }
  0x13   :  { %299 = vmatpush.bf16.msra.mxu2 %v1438_v7  ;;  %v1441_v13 = vor.u32 %v1177_v9, %v1112_v8  ;;  %v1167_v15 = vld [vmem:[#allocation5 + $0x34] sm:$0xf0]  ;;  %v1085_v16 = vor.u32 %v1170_v11, %v1082_v12  ;;  %v1104_v17 = vld [vmem:[#allocation7 + $0x10] sm:$0xf]  ;;  %v1168_v19 = vld [vmem:[#allocation5 + $0x44] sm:$0xf] }
  0x14   :  { %v1175_v18 = vld [vmem:[#allocation7 + $0x14] sm:$0xf0]  ;;  %v1074_v20 = vld [vmem:[#allocation5 + $0x48] sm:$0xf0]  ;;  %v1178_v22 = vld [vmem:[#allocation7 + $0x34] sm:$0xf]  ;;  %v1065_v23 = vor.u32 %v1167_v15, %v1064_v14 }
  0x15   :  { %216 = vmatpush.bf16.msra.mxu1 %v1085_v16  ;;  %v1077_v21 = vor.u32 %v1168_v19, %v1074_v20  ;;  %v1056_v24 = vld [vmem:[#allocation5 + $0x20] sm:$0xf]  ;;  %v1165_v25 = vld [vmem:[#allocation5 + $0x24] sm:$0xf0]  ;;  %v1122_v26 = vld [vmem:[#allocation7 + $0x38] sm:$0xf0]  ;;  %v1444_v27 = vor.u32 %v1175_v18, %v1104_v17 }
  0x16   :  { %188 = vmatpush.bf16.msra.mxu0 %v1073_v10  ;;  %v1446_v28 = vor.u32 %v1178_v22, %v1122_v26  ;;  %v1166_v29 = vld [vmem:[#allocation5 + $0x34] sm:$0xf]  ;;  %v1066_v30 = vld [vmem:[#allocation5 + $0x38] sm:$0xf0]  ;;  %v1176_v31 = vld [vmem:[#allocation7 + $0x24] sm:$0xf]  ;;  %v1057_v38 = vor.u32 %v1165_v25, %v1056_v24 }
  0x17   :  { %300 = vmatpush.bf16.msra.mxu2 %v1441_v13  ;;  %v1096_v32 = vld [vmem:[#allocation7] sm:$0xf]  ;;  %v1173_v33 = vld [vmem:[#allocation7 + $0x4] sm:$0xf0]  ;;  %v1114_v34 = vld [vmem:[#allocation7 + $0x28] sm:$0xf0]  ;;  %v1069_v35 = vor.u32 %v1166_v29, %v1066_v30 }
  0x18   :  { %312 = vmatpush.bf16.msra.mxu3 %v1446_v28  ;;  %v1449_v36 = vor.u32 %v1176_v31, %v1114_v34  ;;  %v1164_v37 = vld [vmem:[#allocation5 + $0x24] sm:$0xf]  ;;  %v1058_v39 = vld [vmem:[#allocation5 + $0x28] sm:$0xf0]  ;;  %v1174_v40 = vld [vmem:[#allocation7 + $0x14] sm:$0xf]  ;;  %v1452_v42 = vor.u32 %v1173_v33, %v1096_v32 }
  0x19   :  { %217 = vmatpush.bf16.msra.mxu1 %v1077_v21  ;;  %v1106_v41 = vld [vmem:[#allocation7 + $0x18] sm:$0xf0]  ;;  %v1048_v43 = vld [vmem:[#allocation5 + $0x10] sm:$0xf]  ;;  %v1163_v44 = vld [vmem:[#allocation5 + $0x14] sm:$0xf0]  ;;  %v1061_v45 = vor.u32 %v1164_v37, %v1058_v39 }
  0x1a   :  { %189 = vmatpush.bf16.msra.mxu0 %v1065_v23  ;;  %v1455_v46 = vor.u32 %v1174_v40, %v1106_v41  ;;  %v1162_v47 = vld [vmem:[#allocation5 + $0x14] sm:$0xf]  ;;  %v1049_v48 = vor.u32 %v1163_v44, %v1048_v43  ;;  %v1050_v49 = vld [vmem:[#allocation5 + $0x18] sm:$0xf0]  ;;  %v1172_v50 = vld [vmem:[#allocation7 + $0x4] sm:$0xf] }
  0x1b   :  { %301 = vmatpush.bf16.msra.mxu2 %v1444_v27  ;;  %v1098_v51 = vld [vmem:[#allocation7 + $0x8] sm:$0xf0]  ;;  %v1040_v52 = vld [vmem:[#allocation5] sm:$0xf]  ;;  %v1161_v53 = vld [vmem:[#allocation5 + $0x4] sm:$0xf0]  ;;  %v1053_v54 = vor.u32 %v1162_v47, %v1050_v49 }
  0x1c   :  { %313 = vmatpush.bf16.msra.mxu3 %v1449_v36  ;;  %v1460_v55 = vor.u32 %v1172_v50, %v1098_v51  ;;  %v1394_v56 = vmov 0   ;;  %v1041_v57 = vor.u32 %v1161_v53, %v1040_v52  ;;  %v1160_v58 = vld [vmem:[#allocation5 + $0x4] sm:$0xf]  ;;  %v1042_v59 = vld [vmem:[#allocation5 + $0x8] sm:$0xf0]  ;;  %vm172_vm0 = vcmask 785408  }
  0x1d   :  { %218 = vmatpush.bf16.msra.mxu1 %v1069_v35  ;;  %v1156_v60 = vld [vmem:[#allocation2] sm:$0xff]  ;;  %v1045_v61 = vor.u32 %v1160_v58, %v1042_v59  ;;  %vm291_vm9 = vcmask 523264   ;;  %s1008_s10 = sshll.u32 %s1678_s4, 4  ;;  %s1009_s10 = int_to_ptr.hbm [resolvable:$true] %s1008_s10 }
  0x1e   :  { %190 = vmatpush.bf16.msra.mxu0 %v1057_v38  ;;  %v86_v62 = vld [vmem:[%s1677_s3] sm:$0x3]  ;;  %s1395_s3 = smov [#allocation8]  }
  0x1f   :  { %302 = vmatpush.bf16.msra.mxu2 %v1452_v42  ;;  %v1499_v63 = vperm.slane %v86_v62, 0  ;;  %v1502_v11 = vperm.slane %v86_v62, 1  ;;  %s1006_s7 = sshll.u32 %s1395_s3, 4  ;;  %s1007_s7 = int_to_ptr.vmem [resolvable:$true] %s1006_s7 }
  0x20   :  { %314 = vmatpush.bf16.msra.mxu3 %v1455_v46 }
  0x21   :  { %219 = vmatpush.bf16.msra.mxu1 %v1061_v45 }
  0x22   :  { %303 = vmatmul.bf16.vlgmr.msra.gmra.mxu2 %v1394_v56  ;;  %191 = vmatpush.bf16.msra.mxu0 %v1049_v48 }
  0x23   :  { %390 = vmatpush.bf16.msrb.mxu2 %v1438_v7 }
  0x24   :  { %315 = vmatpush.bf16.msra.mxu3 %v1460_v55 }
  0x25   :  { %220 = vmatpush.bf16.msra.mxu1 %v1053_v54 }
  0x26   :  { %192 = vmatpush.bf16.msra.mxu0 %v1041_v57 }
  0x27   :  { %391 = vmatpush.bf16.msrb.mxu2 %v1441_v13  ;;  %316 = vmatmul.bf16.vlgmr.msra.gmra.mxu3 %v1394_v56 }
  0x28   :  { %403 = vmatpush.bf16.msrb.mxu3 %v1446_v28 }
  0x29   :  { %1086 = vmatmul.msk.bf16.vlgmr.msra.gmra.mxu0 %vm172_vm0, %v1156_v60  ;;  %221 = vmatpush.bf16.msra.mxu1 %v1045_v61 }
  0x2a   :  { %746 = vmatpush.bf16.msrb.mxu0 %v1438_v7 }
  0x2b   :  { %392 = vmatpush.bf16.msrb.mxu2 %v1444_v27 }
  0x2c   :  { %404 = vmatpush.bf16.msrb.mxu3 %v1449_v36  ;;  %1090 = vmatmul.msk.bf16.vlgmr.msra.gmra.mxu1 %vm172_vm0, %v1156_v60 }
  0x2d   :  { %759 = vmatpush.bf16.msrb.mxu1 %v1446_v28 }
  0x2e   :  { %747 = vmatpush.bf16.msrb.mxu0 %v1441_v13 }
  0x2f   :  { %393 = vmatpush.bf16.msrb.mxu2 %v1452_v42 }
  0x30   :  { %405 = vmatpush.bf16.msrb.mxu3 %v1455_v46 }
  0x31   :  { %760 = vmatpush.bf16.msrb.mxu1 %v1449_v36 }
  0x32   :  { %748 = vmatpush.bf16.msrb.mxu0 %v1444_v27 }
  0x33   :  { %479 = vmatpush.bf16.msra.mxu2 %v1438_v7 }
  0x34   :  { %406 = vmatpush.bf16.msrb.mxu3 %v1460_v55 }
  0x35   :  { %761 = vmatpush.bf16.msrb.mxu1 %v1455_v46 }
  0x36   :  { %749 = vmatpush.bf16.msrb.mxu0 %v1452_v42 }
  0x37   :  { %480 = vmatpush.bf16.msra.mxu2 %v1441_v13 }
  0x38   :  { %492 = vmatpush.bf16.msra.mxu3 %v1446_v28 }
  0x39   :  { %762 = vmatpush.bf16.msrb.mxu1 %v1460_v55 }
  0x3a   :  { %924 = vmatpush.bf16.msra.mxu0 %v1438_v7 }
  0x3b   :  { %481 = vmatpush.bf16.msra.mxu2 %v1444_v27 }
  0x3c   :  { %493 = vmatpush.bf16.msra.mxu3 %v1449_v36 }
  0x3d   :  { %937 = vmatpush.bf16.msra.mxu1 %v1446_v28 }
  0x3e   :  { %925 = vmatpush.bf16.msra.mxu0 %v1441_v13 }
  0x3f   :  { %482 = vmatpush.bf16.msra.mxu2 %v1452_v42 }
  0x40   :  { %494 = vmatpush.bf16.msra.mxu3 %v1455_v46 }
  0x41   :  { %938 = vmatpush.bf16.msra.mxu1 %v1449_v36 }
  0x42   :  { %926 = vmatpush.bf16.msra.mxu0 %v1444_v27 }
  0x44   :  { %495 = vmatpush.bf16.msra.mxu3 %v1460_v55 }
  0x45   :  { %939 = vmatpush.bf16.msra.mxu1 %v1455_v46 }
  0x46   :  { %927 = vmatpush.bf16.msra.mxu0 %v1452_v42 }
  0x49   :  { %940 = vmatpush.bf16.msra.mxu1 %v1460_v55 }
  0xa5   :  { %v304_v0 = vpop.f32.mrf.mxu2 }
  0xa6   :  { %v194_v1 = vpop.f32.mrf.mxu0 }
  0xa7   :  { %v195_v2 = vadd.f32 %v194_v1, %v1499_v63 }
  0xa9   :  { %v321_v3 = vadd.f32 %v304_v0, %v195_v2  ;;  %v223_v12 = vpop.f32.mrf.mxu1 }
  0xaa   :  { %v317_v5 = vpop.f32.mrf.mxu3  ;;  %v224_v14 = vadd.f32 %v223_v12, %v1502_v11 }
  0xab   :  { %v1126_v4 = vmul.f32 -1.442695, %v321_v3 }
  0xac   :  { %v322_v16 = vadd.f32 %v317_v5, %v224_v14 }
  0xad   :  { %1189 = vpow2.f32 %v1126_v4  ;;  %v306_v6 = vpop.f32.mrf.mxu2 }
  0xae   :  { %v1127_v30 = vmul.f32 -1.442695, %v322_v16  ;;  %v196_v53 = vpop.f32.mrf.mxu0 }
  0xaf   :  { %v197_v54 = vadd.f32 %v196_v53, %v1499_v63 }
  0xb1   :  { %v225_v1 = vpop.f32.mrf.mxu1 }
  0xb2   :  { %v319_v9 = vpop.f32.mrf.mxu3  ;;  %v226_v2 = vadd.f32 %v225_v1, %v1502_v11 }
  0xb3   :  { %v1190_v8 = vpop.eup %1189 }
  0xb4   :  { %v329_v10 = vadd.f32 1.0, %v1190_v8 }
  0xb6   :  { %1191 = vrcp.f32 %v329_v10  ;;  %v342_v19 = vand.u32 2147483648, %v329_v10  ;;  %v340_v21 = vand.u32 2147483647, %v329_v10  ;;  %vm336_vm2 = vweird.f32 %v329_v10 }
  0xb7   :  { %1193 = vtanh.f32 %v322_v16 }
  0xb8   :  { %v343_v24 = vor.u32 1.1754944e-38, %v342_v19  ;;  %vm341_vm4 = vcmp.eq.f32.partialorder %v340_v21, 8.507059e+37  ;;  %1195 = vpow2.f32 %v1127_v30 }
  0xbc   :  { %v1192_v15 = vpop.eup %1191 }
  0xbd   :  { %v332_v17 = vmul.f32 %v1192_v15, %v329_v10  ;;  %vm337_vm1 = vweird.f32 %v1192_v15  ;;  %v1194_v23 = vpop.eup %1193 }
  0xbe   :  { %vm338_vm3 = vmor %vm336_vm2, %vm337_vm1  ;;  %v1196_v31 = vpop.eup %1195 }
  0xbf   :  { %v333_v18 = vsub.f32 1.0, %v332_v17  ;;  %v330_v32 = vadd.f32 1.0, %v1196_v31 }
  0xc1   :  { %v334_v20 = vmul.f32 %v1192_v15, %v333_v18  ;;  %1197 = vrcp.f32 %v330_v32  ;;  %vm351_vm5 = vweird.f32 %v330_v32  ;;  %v357_v41 = vand.u32 2147483648, %v330_v32 }
  0xc2   :  { %v355_v44 = vand.u32 2147483647, %v330_v32 }
  0xc3   :  { %v335_v22 = vadd.f32 %v1192_v15, %v334_v20  ;;  %v358_v45 = vor.u32 1.1754944e-38, %v357_v41 }
  0xc4   :  { %vm356_vm8 = vcmp.eq.f32.partialorder %v355_v44, 8.507059e+37 }
  0xc5   :  { %v339_v25 = vsel %vm338_vm3, %v1192_v15, %v335_v22  ;;  %v1157_v22 = vld [vmem:[#allocation2 + $0x8] sm:$0xff] }
  0xc6   :  { %v344_v26 = vsel %vm341_vm4, %v343_v24, %v339_v25  ;;  %1087 = vmatmul.msk.bf16.gmra.mxu0 %vm172_vm0, %v1157_v22  ;;  %1091 = vmatmul.msk.bf16.gmra.mxu1 %vm172_vm0, %v1157_v22 }
  0xc7   :  { %v363_v29 = vmul.f32 %v1194_v23, %v344_v26  ;;  %v1198_v33 = vpop.eup %1197  ;;  %v362_v38 = vmul.f32 0.0, %v344_v26 }
  0xc8   :  { %v347_v34 = vmul.f32 %v1198_v33, %v330_v32  ;;  %vm352_vm6 = vweird.f32 %v1198_v33 }
  0xc9   :  { %365 = vrot.lane.b32.xlu0 %v363_v29, %s1391_s1  ;;  %vm353_vm7 = vmor %vm351_vm5, %vm352_vm6 }
  0xca   :  { %v348_v35 = vsub.f32 1.0, %v347_v34 }
  0xcc   :  { %v349_v37 = vmul.f32 %v1198_v33, %v348_v35 }
  0xce   :  { %v350_v43 = vadd.f32 %v1198_v33, %v349_v37 }
  0xd0   :  { %v354_v47 = vsel %vm353_vm7, %v1198_v33, %v350_v43 }
  0xd1   :  { %v359_v49 = vsel %vm356_vm8, %v358_v45, %v354_v47 }
 0x13b   :  { %v366_v39 = vpop.permute.xlu0 %365 }
 0x13c   :  { %v1506_v40 = vadd.f32 %v366_v39, %v362_v38 }
 0x13e   :  { %1199 = vtanh.f32 %v1506_v40 }
 0x143   :  { %v199_v44 = vpop.f32.mrf.mxu0 }
 0x144   :  { %v1200_v48 = vpop.eup %1199  ;;  %v200_v45 = vadd.f32 %v199_v44, %v1499_v63 }
 0x145   :  { %v1509_v50 = vmul.f32 %v1200_v48, %v359_v49 }
 0x147   :  { %v379_v51 = vpack.c.bf16 %v1509_v50, %v1509_v50 }
 0x149   :  { %381 = vrot.lane.b32.xlu0 %v379_v51, %s1391_s1 }
 0x1bb   :  { %v382_v52 = vpop.permute.xlu0 %381 }
 0x1bc   :  { %1128 = vmatmul.msk.bf16.vlgmr.msrb.gmra.mxu2 %vm291_vm9, %v382_v52  ;;  %1129 = vmatmul.msk.bf16.vlgmr.msrb.gmra.mxu3 %vm291_vm9, %v382_v52 }
 0x1bd   :  { %568 = vmatpush.bf16.msrb.mxu2 %v1438_v7  ;;  %581 = vmatpush.bf16.msrb.mxu3 %v1446_v28 }
 0x1c1   :  { %569 = vmatpush.bf16.msrb.mxu2 %v1441_v13  ;;  %582 = vmatpush.bf16.msrb.mxu3 %v1449_v36 }
 0x1c5   :  { %570 = vmatpush.bf16.msrb.mxu2 %v1444_v27  ;;  %583 = vmatpush.bf16.msrb.mxu3 %v1455_v46 }
 0x1c9   :  { %571 = vmatpush.bf16.msrb.mxu2 %v1452_v42  ;;  %584 = vmatpush.bf16.msrb.mxu3 %v1460_v55 }
 0x23f   :  { %v395_v56 = vpop.f32.mrf.mxu2  ;;  %v408_v57 = vpop.f32.mrf.mxu3 }
 0x240   :  { %v412_v58 = vadd.f32 %v395_v56, %v197_v54  ;;  %v413_v4 = vadd.f32 %v408_v57, %v226_v2  ;;  %v228_v57 = vpop.f32.mrf.mxu1 }
 0x242   :  { %v1130_v59 = vmul.f32 -1.442695, %v412_v58  ;;  %v1131_v19 = vmul.f32 -1.442695, %v413_v4  ;;  %v229_v58 = vadd.f32 %v228_v57, %v1502_v11 }
 0x244   :  { %1201 = vpow2.f32 %v1130_v59 }
 0x247   :  { %v397_v60 = vpop.f32.mrf.mxu2  ;;  %v410_v61 = vpop.f32.mrf.mxu3 }
 0x24a   :  { %v1202_v62 = vpop.eup %1201 }
 0x24b   :  { %v420_v0 = vadd.f32 1.0, %v1202_v62 }
 0x24d   :  { %1203 = vrcp.f32 %v420_v0  ;;  %v433_v8 = vand.u32 2147483648, %v420_v0  ;;  %v431_v10 = vand.u32 2147483647, %v420_v0  ;;  %vm427_vm11 = vweird.f32 %v420_v0 }
 0x24e   :  { %1205 = vtanh.f32 %v413_v4 }
 0x24f   :  { %v434_v14 = vor.u32 1.1754944e-38, %v433_v8  ;;  %vm432_vm13 = vcmp.eq.f32.partialorder %v431_v10, 8.507059e+37  ;;  %1207 = vpow2.f32 %v1131_v19 }
 0x253   :  { %v1204_v3 = vpop.eup %1203 }
 0x254   :  { %v423_v5 = vmul.f32 %v1204_v3, %v420_v0  ;;  %vm428_vm10 = vweird.f32 %v1204_v3  ;;  %v1206_v16 = vpop.eup %1205 }
 0x255   :  { %vm429_vm12 = vmor %vm427_vm11, %vm428_vm10  ;;  %v1208_v20 = vpop.eup %1207 }
 0x256   :  { %v424_v6 = vsub.f32 1.0, %v423_v5  ;;  %v421_v21 = vadd.f32 1.0, %v1208_v20 }
 0x258   :  { %v425_v9 = vmul.f32 %v1204_v3, %v424_v6  ;;  %1209 = vrcp.f32 %v421_v21  ;;  %v448_v33 = vand.u32 2147483648, %v421_v21  ;;  %vm442_vm15 = vweird.f32 %v421_v21 }
 0x259   :  { %v446_v34 = vand.u32 2147483647, %v421_v21 }
 0x25a   :  { %v426_v12 = vadd.f32 %v1204_v3, %v425_v9  ;;  %v449_v37 = vor.u32 1.1754944e-38, %v448_v33 }
 0x25b   :  { %vm447_vm2 = vcmp.eq.f32.partialorder %v446_v34, 8.507059e+37  ;;  %v201_v34 = vpop.f32.mrf.mxu0 }
 0x25c   :  { %v430_v15 = vsel %vm429_vm12, %v1204_v3, %v426_v12 }
 0x25d   :  { %v435_v17 = vsel %vm432_vm13, %v434_v14, %v430_v15 }
 0x25e   :  { %v454_v18 = vmul.f32 %v1206_v16, %v435_v17  ;;  %v1210_v23 = vpop.eup %1209  ;;  %v453_v29 = vmul.f32 %v435_v17, %v1506_v40 }
 0x25f   :  { %v438_v24 = vmul.f32 %v1210_v23, %v421_v21  ;;  %vm443_vm14 = vweird.f32 %v1210_v23 }
 0x260   :  { %456 = vrot.lane.b32.xlu1 %v454_v18, %s1391_s1  ;;  %vm444_vm1 = vmor %vm442_vm15, %vm443_vm14 }
 0x261   :  { %v439_v25 = vsub.f32 1.0, %v438_v24 }
 0x263   :  { %v440_v26 = vmul.f32 %v1210_v23, %v439_v25 }
 0x265   :  { %v441_v32 = vadd.f32 %v1210_v23, %v440_v26 }
 0x267   :  { %v445_v35 = vsel %vm444_vm1, %v1210_v23, %v441_v32 }
 0x268   :  { %v450_v39 = vsel %vm447_vm2, %v449_v37, %v445_v35  ;;  %v202_v35 = vadd.f32 %v201_v34, %v1499_v63 }
 0x2d2   :  { %v457_v30 = vpop.permute.xlu1 %456 }
 0x2d3   :  { %v1530_v31 = vadd.f32 %v457_v30, %v453_v29 }
 0x2d5   :  { %1211 = vtanh.f32 %v1530_v31 }
 0x2db   :  { %v1212_v38 = vpop.eup %1211 }
 0x2dc   :  { %v1533_v41 = vmul.f32 %v1212_v38, %v450_v39 }
 0x2de   :  { %v468_v40 = vpack.c.bf16 %v1533_v41, %v1533_v41 }
 0x2e0   :  { %470 = vrot.lane.b32.xlu1 %v468_v40, %s1391_s1 }
 0x352   :  { %v471_v43 = vpop.permute.xlu1 %470 }
 0x353   :  { %1132 = vmatmul.msk.bf16.vlgmr.msra.gmra.mxu2 %vm291_vm9, %v471_v43  ;;  %1133 = vmatmul.msk.bf16.vlgmr.msra.gmra.mxu3 %vm291_vm9, %v471_v43 }
 0x354   :  { %657 = vmatpush.bf16.msra.mxu2 %v1438_v7  ;;  %670 = vmatpush.bf16.msra.mxu3 %v1446_v28 }
 0x358   :  { %658 = vmatpush.bf16.msra.mxu2 %v1441_v13  ;;  %671 = vmatpush.bf16.msra.mxu3 %v1449_v36 }
 0x35c   :  { %659 = vmatpush.bf16.msra.mxu2 %v1444_v27  ;;  %672 = vmatpush.bf16.msra.mxu3 %v1455_v46 }
 0x360   :  { %660 = vmatpush.bf16.msra.mxu2 %v1452_v42  ;;  %673 = vmatpush.bf16.msra.mxu3 %v1460_v55 }
 0x3d6   :  { %v484_v47 = vpop.f32.mrf.mxu2  ;;  %v497_v48 = vpop.f32.mrf.mxu3 }
 0x3d7   :  { %v501_v49 = vadd.f32 %v484_v47, %v200_v45  ;;  %v502_v60 = vadd.f32 %v497_v48, %v229_v58 }
 0x3d9   :  { %v1134_v51 = vmul.f32 -1.442695, %v501_v49  ;;  %v1135_v10 = vmul.f32 -1.442695, %v502_v60 }
 0x3db   :  { %1213 = vpow2.f32 %v1134_v51 }
 0x3de   :  { %v486_v52 = vpop.f32.mrf.mxu2  ;;  %v499_v53 = vpop.f32.mrf.mxu3 }
 0x3e1   :  { %v1214_v54 = vpop.eup %1213 }
 0x3e2   :  { %v509_v56 = vadd.f32 1.0, %v1214_v54 }
 0x3e4   :  { %1215 = vrcp.f32 %v509_v56  ;;  %v522_v0 = vand.u32 2147483648, %v509_v56  ;;  %v520_v2 = vand.u32 2147483647, %v509_v56  ;;  %vm516_vm4 = vweird.f32 %v509_v56 }
 0x3e5   :  { %1217 = vtanh.f32 %v502_v60  ;;  %v1158_v60 = vld [vmem:[#allocation2 + $0x10] sm:$0xff] }
 0x3e6   :  { %v523_v4 = vor.u32 1.1754944e-38, %v522_v0  ;;  %vm521_vm6 = vcmp.eq.f32.partialorder %v520_v2, 8.507059e+37  ;;  %1219 = vpow2.f32 %v1135_v10  ;;  %1088 = vmatmul.msk.bf16.gmra.mxu0 %vm172_vm0, %v1158_v60  ;;  %1092 = vmatmul.msk.bf16.gmra.mxu1 %vm172_vm0, %v1158_v60 }
 0x3ea   :  { %v1216_v59 = vpop.eup %1215 }
 0x3eb   :  { %v512_v61 = vmul.f32 %v1216_v59, %v509_v56  ;;  %vm517_vm3 = vweird.f32 %v1216_v59  ;;  %v1218_v6 = vpop.eup %1217 }
 0x3ec   :  { %vm518_vm5 = vmor %vm516_vm4, %vm517_vm3  ;;  %v1220_v12 = vpop.eup %1219 }
 0x3ed   :  { %v513_v62 = vsub.f32 1.0, %v512_v61  ;;  %v510_v14 = vadd.f32 1.0, %v1220_v12 }
 0x3ef   :  { %v514_v1 = vmul.f32 %v1216_v59, %v513_v62  ;;  %1221 = vrcp.f32 %v510_v14  ;;  %v537_v23 = vand.u32 2147483648, %v510_v14  ;;  %vm531_vm8 = vweird.f32 %v510_v14 }
 0x3f0   :  { %v535_v24 = vand.u32 2147483647, %v510_v14 }
 0x3f1   :  { %v515_v3 = vadd.f32 %v1216_v59, %v514_v1  ;;  %v538_v26 = vor.u32 1.1754944e-38, %v537_v23 }
 0x3f2   :  { %vm536_vm11 = vcmp.eq.f32.partialorder %v535_v24, 8.507059e+37 }
 0x3f3   :  { %v519_v5 = vsel %vm518_vm5, %v1216_v59, %v515_v3 }
 0x3f4   :  { %v524_v8 = vsel %vm521_vm6, %v523_v4, %v519_v5 }
 0x3f5   :  { %v543_v9 = vmul.f32 %v1218_v6, %v524_v8  ;;  %v1222_v15 = vpop.eup %1221  ;;  %v542_v19 = vmul.f32 %v524_v8, %v1530_v31 }
 0x3f6   :  { %v527_v16 = vmul.f32 %v1222_v15, %v510_v14  ;;  %vm532_vm7 = vweird.f32 %v1222_v15 }
 0x3f7   :  { %545 = vrot.lane.b32.xlu2 %v543_v9, %s1391_s1  ;;  %vm533_vm10 = vmor %vm531_vm8, %vm532_vm7 }
 0x3f8   :  { %v528_v17 = vsub.f32 1.0, %v527_v16 }
 0x3fa   :  { %v529_v18 = vmul.f32 %v1222_v15, %v528_v17 }
 0x3fc   :  { %v530_v22 = vadd.f32 %v1222_v15, %v529_v18 }
 0x3fe   :  { %v534_v25 = vsel %vm533_vm10, %v1222_v15, %v530_v22 }
 0x3ff   :  { %v539_v30 = vsel %vm536_vm11, %v538_v26, %v534_v25 }
 0x451   :  { %v546_v20 = vpop.permute.xlu2 %545 }
 0x452   :  { %v1552_v21 = vadd.f32 %v546_v20, %v542_v19 }
 0x454   :  { %1223 = vtanh.f32 %v1552_v21 }
 0x45a   :  { %v1224_v29 = vpop.eup %1223 }
 0x45b   :  { %v1555_v32 = vmul.f32 %v1224_v29, %v539_v30 }
 0x45d   :  { %v557_v31 = vpack.c.bf16 %v1555_v32, %v1555_v32 }
 0x45f   :  { %559 = vrot.lane.b32.xlu2 %v557_v31, %s1391_s1 }
 0x463   :  { %v204_v18 = vpop.f32.mrf.mxu0 }
 0x464   :  { %v205_v19 = vadd.f32 %v204_v18, %v1499_v63 }
 0x4b9   :  { %v560_v33 = vpop.permute.xlu2 %559 }
 0x4ba   :  { %1136 = vmatmul.msk.bf16.vlgmr.msrb.gmra.mxu2 %vm291_vm9, %v560_v33  ;;  %1137 = vmatmul.msk.bf16.vlgmr.msrb.gmra.mxu3 %vm291_vm9, %v560_v33 }
 0x4bb   :  { %835 = vmatpush.bf16.msrb.mxu2 %v1438_v7  ;;  %848 = vmatpush.bf16.msrb.mxu3 %v1446_v28 }
 0x4bf   :  { %836 = vmatpush.bf16.msrb.mxu2 %v1441_v13  ;;  %849 = vmatpush.bf16.msrb.mxu3 %v1449_v36 }
 0x4c3   :  { %837 = vmatpush.bf16.msrb.mxu2 %v1444_v27  ;;  %850 = vmatpush.bf16.msrb.mxu3 %v1455_v46  ;;  %v230_v27 = vpop.f32.mrf.mxu1 }
 0x4c4   :  { %v231_v46 = vadd.f32 %v230_v27, %v1502_v11 }
 0x4c7   :  { %838 = vmatpush.bf16.msrb.mxu2 %v1452_v42  ;;  %851 = vmatpush.bf16.msrb.mxu3 %v1460_v55 }
 0x4cb   :  { %v233_v30 = vpop.f32.mrf.mxu1 }
 0x4cc   :  { %v234_v31 = vadd.f32 %v233_v30, %v1502_v11 }
 0x53d   :  { %v573_v37 = vpop.f32.mrf.mxu2  ;;  %v586_v38 = vpop.f32.mrf.mxu3 }
 0x53e   :  { %v590_v7 = vadd.f32 %v573_v37, %v202_v35  ;;  %v591_v42 = vadd.f32 %v586_v38, %v231_v46 }
 0x540   :  { %v1138_v39 = vmul.f32 -1.442695, %v590_v7  ;;  %v1139_v57 = vmul.f32 -1.442695, %v591_v42 }
 0x542   :  { %1225 = vpow2.f32 %v1138_v39 }
 0x545   :  { %v575_v28 = vpop.f32.mrf.mxu2  ;;  %v588_v13 = vpop.f32.mrf.mxu3 }
 0x548   :  { %v1226_v40 = vpop.eup %1225 }
 0x549   :  { %v598_v36 = vadd.f32 1.0, %v1226_v40 }
 0x54b   :  { %1227 = vrcp.f32 %v598_v36  ;;  %v611_v45 = vand.u32 2147483648, %v598_v36  ;;  %v609_v48 = vand.u32 2147483647, %v598_v36  ;;  %vm605_vm13 = vweird.f32 %v598_v36 }
 0x54c   :  { %1229 = vtanh.f32 %v591_v42 }
 0x54d   :  { %v612_v51 = vor.u32 1.1754944e-38, %v611_v45  ;;  %vm610_vm15 = vcmp.eq.f32.partialorder %v609_v48, 8.507059e+37  ;;  %1231 = vpow2.f32 %v1139_v57 }
 0x551   :  { %v1228_v43 = vpop.eup %1227 }
 0x552   :  { %v601_v44 = vmul.f32 %v1228_v43, %v598_v36  ;;  %vm606_vm12 = vweird.f32 %v1228_v43  ;;  %v1230_v53 = vpop.eup %1229 }
 0x553   :  { %vm607_vm14 = vmor %vm605_vm13, %vm606_vm12  ;;  %v1232_v58 = vpop.eup %1231 }
 0x554   :  { %v602_v55 = vsub.f32 1.0, %v601_v44  ;;  %v599_v59 = vadd.f32 1.0, %v1232_v58 }
 0x556   :  { %v603_v47 = vmul.f32 %v1228_v43, %v602_v55  ;;  %1233 = vrcp.f32 %v599_v59  ;;  %v626_v6 = vand.u32 2147483648, %v599_v59  ;;  %vm620_vm2 = vweird.f32 %v599_v59  ;;  %v1159_v55 = vld [vmem:[#allocation2 + $0x18] sm:$0xff] }
 0x557   :  { %v624_v8 = vand.u32 2147483647, %v599_v59  ;;  %1089 = vmatmul.msk.bf16.gmra.mxu0 %vm172_vm0, %v1159_v55  ;;  %1093 = vmatmul.msk.bf16.gmra.mxu1 %vm172_vm0, %v1159_v55 }
 0x558   :  { %v604_v49 = vadd.f32 %v1228_v43, %v603_v47  ;;  %v627_v10 = vor.u32 1.1754944e-38, %v626_v6 }
 0x559   :  { %vm625_vm4 = vcmp.eq.f32.partialorder %v624_v8, 8.507059e+37 }
 0x55a   :  { %v608_v52 = vsel %vm607_vm14, %v1228_v43, %v604_v49 }
 0x55b   :  { %v613_v54 = vsel %vm610_vm15, %v612_v51, %v608_v52 }
 0x55c   :  { %v632_v56 = vmul.f32 %v1230_v53, %v613_v54  ;;  %v1234_v61 = vpop.eup %1233  ;;  %v631_v2 = vmul.f32 %v613_v54, %v1552_v21 }
 0x55d   :  { %v616_v62 = vmul.f32 %v1234_v61, %v599_v59  ;;  %vm621_vm1 = vweird.f32 %v1234_v61 }
 0x55e   :  { %634 = vrot.lane.b32.xlu0 %v632_v56, %s1391_s1  ;;  %vm622_vm3 = vmor %vm620_vm2, %vm621_vm1 }
 0x55f   :  { %v617_v0 = vsub.f32 1.0, %v616_v62 }
 0x561   :  { %v618_v1 = vmul.f32 %v1234_v61, %v617_v0 }
 0x563   :  { %v619_v5 = vadd.f32 %v1234_v61, %v618_v1 }
 0x565   :  { %v623_v9 = vsel %vm622_vm3, %v1234_v61, %v619_v5 }
 0x566   :  { %v628_v14 = vsel %vm625_vm4, %v627_v10, %v623_v9 }
 0x5d0   :  { %v635_v3 = vpop.permute.xlu0 %634 }
 0x5d1   :  { %v1576_v4 = vadd.f32 %v635_v3, %v631_v2  ;;  %v235_v2 = vpop.f32.mrf.mxu1  ;;  %v206_v3 = vpop.f32.mrf.mxu0 }
 0x5d2   :  { %v207_v9 = vadd.f32 %v206_v3, %v1499_v63 }
 0x5d3   :  { %1235 = vtanh.f32 %v1576_v4 }
 0x5d9   :  { %v1236_v12 = vpop.eup %1235  ;;  %v1604_v5 = vpop.f32.mrf.mxu0 }
 0x5da   :  { %v1579_v15 = vmul.f32 %v1236_v12, %v628_v14 }
 0x5dc   :  { %v646_v16 = vpack.c.bf16 %v1579_v15, %v1579_v15 }
 0x5de   :  { %648 = vrot.lane.b32.xlu1 %v646_v16, %s1391_s1 }
 0x5e1   :  { %v1608_v8 = vpop.f32.mrf.mxu0 }
 0x650   :  { %v649_v17 = vpop.permute.xlu1 %648 }
 0x651   :  { %1140 = vmatmul.msk.bf16.vlgmr.msra.gmra.mxu2 %vm291_vm9, %v649_v17  ;;  %1141 = vmatmul.msk.bf16.vlgmr.msra.gmra.mxu3 %vm291_vm9, %v649_v17 }
 0x6d4   :  { %v662_v20 = vpop.f32.mrf.mxu2  ;;  %v675_v21 = vpop.f32.mrf.mxu3 }
 0x6d5   :  { %v679_v22 = vadd.f32 %v662_v20, %v205_v19  ;;  %v680_v34 = vadd.f32 %v675_v21, %v234_v31  ;;  %v236_v21 = vadd.f32 %v235_v2, %v1502_v11 }
 0x6d7   :  { %v1142_v23 = vmul.f32 -1.442695, %v679_v22  ;;  %v1143_v43 = vmul.f32 -1.442695, %v680_v34 }
 0x6d9   :  { %1237 = vpow2.f32 %v1142_v23 }
 0x6dc   :  { %v664_v24 = vpop.f32.mrf.mxu2  ;;  %v677_v25 = vpop.f32.mrf.mxu3 }
 0x6df   :  { %v1238_v26 = vpop.eup %1237 }
 0x6e0   :  { %v687_v29 = vadd.f32 1.0, %v1238_v26 }
 0x6e2   :  { %1239 = vrcp.f32 %v687_v29  ;;  %v700_v38 = vand.u32 2147483648, %v687_v29  ;;  %v698_v39 = vand.u32 2147483647, %v687_v29  ;;  %vm694_vm6 = vweird.f32 %v687_v29 }
 0x6e3   :  { %1241 = vtanh.f32 %v680_v34 }
 0x6e4   :  { %v701_v13 = vor.u32 1.1754944e-38, %v700_v38  ;;  %vm699_vm8 = vcmp.eq.f32.partialorder %v698_v39, 8.507059e+37  ;;  %1243 = vpow2.f32 %v1143_v43 }
 0x6e8   :  { %v1240_v33 = vpop.eup %1239 }
 0x6e9   :  { %v690_v35 = vmul.f32 %v1240_v33, %v687_v29  ;;  %vm695_vm5 = vweird.f32 %v1240_v33  ;;  %v1242_v36 = vpop.eup %1241 }
 0x6ea   :  { %vm696_vm7 = vmor %vm694_vm6, %vm695_vm5  ;;  %v1244_v42 = vpop.eup %1243 }
 0x6eb   :  { %v691_v37 = vsub.f32 1.0, %v690_v35  ;;  %v688_v44 = vadd.f32 1.0, %v1244_v42 }
 0x6ed   :  { %v692_v7 = vmul.f32 %v1240_v33, %v691_v37  ;;  %1245 = vrcp.f32 %v688_v44  ;;  %v715_v56 = vand.u32 2147483648, %v688_v44  ;;  %vm709_vm11 = vweird.f32 %v688_v44 }
 0x6ee   :  { %v713_v57 = vand.u32 2147483647, %v688_v44 }
 0x6ef   :  { %v693_v28 = vadd.f32 %v1240_v33, %v692_v7  ;;  %v716_v59 = vor.u32 1.1754944e-38, %v715_v56  ;;  %v210_v56 = vadd.f32 %v1604_v5, %v1499_v63 }
 0x6f0   :  { %vm714_vm0 = vcmp.eq.f32.partialorder %v713_v57, 8.507059e+37 }
 0x6f1   :  { %v697_v40 = vsel %vm696_vm7, %v1240_v33, %v693_v28 }
 0x6f2   :  { %v702_v27 = vsel %vm699_vm8, %v701_v13, %v697_v40 }
 0x6f3   :  { %v721_v46 = vmul.f32 %v1242_v36, %v702_v27  ;;  %v1246_v45 = vpop.eup %1245  ;;  %v720_v51 = vmul.f32 %v702_v27, %v1576_v4  ;;  %v1602_v4 = vpop.f32.mrf.mxu1 }
 0x6f4   :  { %v705_v47 = vmul.f32 %v1246_v45, %v688_v44  ;;  %vm710_vm10 = vweird.f32 %v1246_v45  ;;  %v239_v3 = vadd.f32 %v1602_v4, %v1502_v11 }
 0x6f5   :  { %723 = vrot.lane.b32.xlu2 %v721_v46, %s1391_s1  ;;  %vm711_vm12 = vmor %vm709_vm11, %vm710_vm10 }
 0x6f6   :  { %v706_v48 = vsub.f32 1.0, %v705_v47 }
 0x6f8   :  { %v707_v49 = vmul.f32 %v1246_v45, %v706_v48 }
 0x6fa   :  { %v708_v54 = vadd.f32 %v1246_v45, %v707_v49 }
 0x6fb   :  { %v1606_v6 = vpop.f32.mrf.mxu1 }
 0x6fc   :  { %v712_v58 = vsel %vm711_vm12, %v1246_v45, %v708_v54 }
 0x6fd   :  { %v717_v61 = vsel %vm714_vm0, %v716_v59, %v712_v58 }
 0x74f   :  { %v724_v52 = vpop.permute.xlu2 %723 }
 0x750   :  { %v1592_v53 = vadd.f32 %v724_v52, %v720_v51 }
 0x752   :  { %1247 = vtanh.f32 %v1592_v53 }
 0x758   :  { %v1248_v60 = vpop.eup %1247 }
 0x759   :  { %v1595_v62 = vmul.f32 %v1248_v60, %v717_v61 }
 0x75b   :  { %v735_v0 = vpack.c.bf16 %v1595_v62, %v1595_v62 }
 0x75d   :  { %737 = vrot.lane.b32.xlu0 %v735_v0, %s1391_s1 }
 0x7cf   :  { %v738_v1 = vpop.permute.xlu0 %737 }
 0x7d0   :  { %1144 = vmatmul.msk.bf16.vlgmr.msrb.gmra.mxu0 %vm291_vm9, %v738_v1  ;;  %1145 = vmatmul.msk.bf16.vlgmr.msrb.gmra.mxu1 %vm291_vm9, %v738_v1 }
 0x84d   :  { %v751_v10 = vpop.f32.mrf.mxu0  ;;  %v764_v12 = vpop.f32.mrf.mxu1 }
 0x84e   :  { %v768_v14 = vadd.f32 %v751_v10, %v207_v9  ;;  %v769_v23 = vadd.f32 %v764_v12, %v236_v21 }
 0x850   :  { %v1146_v16 = vmul.f32 -1.442695, %v768_v14  ;;  %v1147_v7 = vmul.f32 -1.442695, %v769_v23 }
 0x852   :  { %1249 = vpow2.f32 %v1146_v16 }
 0x855   :  { %v753_v17 = vpop.f32.mrf.mxu0  ;;  %v766_v18 = vpop.f32.mrf.mxu1 }
 0x858   :  { %v1250_v19 = vpop.eup %1249 }
 0x859   :  { %v776_v20 = vadd.f32 1.0, %v1250_v19 }
 0x85b   :  { %1251 = vrcp.f32 %v776_v20  ;;  %v789_v26 = vand.u32 2147483648, %v776_v20  ;;  %v787_v30 = vand.u32 2147483647, %v776_v20  ;;  %vm783_vm14 = vweird.f32 %v776_v20 }
 0x85c   :  { %1253 = vtanh.f32 %v769_v23 }
 0x85d   :  { %v790_v33 = vor.u32 1.1754944e-38, %v789_v26  ;;  %vm788_vm1 = vcmp.eq.f32.partialorder %v787_v30, 8.507059e+37  ;;  %1255 = vpow2.f32 %v1147_v7 }
 0x861   :  { %v1252_v22 = vpop.eup %1251 }
 0x862   :  { %v779_v24 = vmul.f32 %v1252_v22, %v776_v20  ;;  %vm784_vm13 = vweird.f32 %v1252_v22  ;;  %v1254_v35 = vpop.eup %1253 }
 0x863   :  { %vm785_vm15 = vmor %vm783_vm14, %vm784_vm13  ;;  %v1256_v39 = vpop.eup %1255  ;;  %vm375_vm13 = vcmask 261120   ;;  %vm377_vm14 = vcmask 523520  }
 0x864   :  { %v780_v25 = vsub.f32 1.0, %v779_v24  ;;  %v777_v28 = vadd.f32 1.0, %v1256_v39 }
 0x866   :  { %v781_v29 = vmul.f32 %v1252_v22, %v780_v25  ;;  %1257 = vrcp.f32 %v777_v28  ;;  %v804_v55 = vand.u32 2147483648, %v777_v28  ;;  %vm798_vm3 = vweird.f32 %v777_v28 }
 0x867   :  { %v802_v45 = vand.u32 2147483647, %v777_v28 }
 0x868   :  { %v782_v31 = vadd.f32 %v1252_v22, %v781_v29  ;;  %v805_v48 = vor.u32 1.1754944e-38, %v804_v55 }
 0x869   :  { %vm803_vm5 = vcmp.eq.f32.partialorder %v802_v45, 8.507059e+37 }
 0x86a   :  { %v786_v34 = vsel %vm785_vm15, %v1252_v22, %v782_v31 }
 0x86b   :  { %v791_v37 = vsel %vm788_vm1, %v790_v33, %v786_v34 }
 0x86c   :  { %v810_v38 = vmul.f32 %v1254_v35, %v791_v37  ;;  %v1258_v13 = vpop.eup %1257  ;;  %v809_v46 = vmul.f32 %v791_v37, %v1592_v53 }
 0x86d   :  { %v794_v40 = vmul.f32 %v1258_v13, %v777_v28  ;;  %vm799_vm2 = vweird.f32 %v1258_v13 }
 0x86e   :  { %812 = vrot.lane.b32.xlu1 %v810_v38, %s1391_s1  ;;  %vm800_vm4 = vmor %vm798_vm3, %vm799_vm2 }
 0x86f   :  { %v795_v36 = vsub.f32 1.0, %v794_v40 }
 0x871   :  { %v796_v27 = vmul.f32 %v1258_v13, %v795_v36 }
 0x873   :  { %v797_v44 = vadd.f32 %v1258_v13, %v796_v27 }
 0x875   :  { %v801_v47 = vsel %vm800_vm4, %v1258_v13, %v797_v44 }
 0x876   :  { %v806_v51 = vsel %vm803_vm5, %v805_v48, %v801_v47 }
 0x8e0   :  { %v813_v43 = vpop.permute.xlu1 %812 }
 0x8e1   :  { %v815_v42 = vadd.f32 %v813_v43, %v809_v46 }
 0x8e3   :  { %1259 = vtanh.f32 %v815_v42 }
 0x8e9   :  { %v1260_v49 = vpop.eup %1259 }
 0x8ea   :  { %v1614_v52 = vmul.f32 %v1260_v49, %v806_v51 }
 0x8ec   :  { %v824_v54 = vpack.c.bf16 %v1614_v52, %v1614_v52 }
 0x8ee   :  { %826 = vrot.lane.b32.xlu2 %v824_v54, %s1391_s1 }
 0x948   :  { %v827_v53 = vpop.permute.xlu2 %826 }
 0x949   :  { %1148 = vmatmul.msk.bf16.vlgmr.msrb.gmra.mxu2 %vm291_vm9, %v827_v53  ;;  %1149 = vmatmul.msk.bf16.vlgmr.msrb.gmra.mxu3 %vm291_vm9, %v827_v53  ;;  %v241_v53 = vadd.f32 %v1606_v6, %v1502_v11 }
 0x9cc   :  { %v840_v57 = vpop.f32.mrf.mxu2  ;;  %v853_v58 = vpop.f32.mrf.mxu3 }
 0x9cd   :  { %v857_v59 = vadd.f32 %v840_v57, %v210_v56  ;;  %v858_v10 = vadd.f32 %v853_v58, %v239_v3 }
 0x9cf   :  { %v1150_v60 = vmul.f32 -1.442695, %v857_v59  ;;  %v1151_v4 = vmul.f32 -1.442695, %v858_v10 }
 0x9d1   :  { %1261 = vpow2.f32 %v1150_v60 }
 0x9d4   :  { %v842_v61 = vpop.f32.mrf.mxu2  ;;  %v855_v0 = vpop.f32.mrf.mxu3 }
 0x9d7   :  { %v1262_v1 = vpop.eup %1261 }
 0x9d8   :  { %v865_v2 = vadd.f32 1.0, %v1262_v1 }
 0x9da   :  { %1263 = vrcp.f32 %v865_v2  ;;  %v878_v16 = vand.u32 2147483648, %v865_v2  ;;  %v876_v17 = vand.u32 2147483647, %v865_v2  ;;  %vm872_vm7 = vweird.f32 %v865_v2 }
 0x9db   :  { %1265 = vtanh.f32 %v858_v10 }
 0x9dc   :  { %v879_v19 = vor.u32 1.1754944e-38, %v878_v16  ;;  %vm877_vm10 = vcmp.eq.f32.partialorder %v876_v17, 8.507059e+37  ;;  %1267 = vpow2.f32 %v1151_v4 }
 0x9e0   :  { %v1264_v9 = vpop.eup %1263 }
 0x9e1   :  { %v868_v12 = vmul.f32 %v1264_v9, %v865_v2  ;;  %vm873_vm6 = vweird.f32 %v1264_v9  ;;  %v1266_v21 = vpop.eup %1265 }
 0x9e2   :  { %vm874_vm8 = vmor %vm872_vm7, %vm873_vm6  ;;  %v1268_v24 = vpop.eup %1267 }
 0x9e3   :  { %v869_v14 = vsub.f32 1.0, %v868_v12  ;;  %v866_v25 = vadd.f32 1.0, %v1268_v24 }
 0x9e5   :  { %v870_v5 = vmul.f32 %v1264_v9, %v869_v14  ;;  %1269 = vrcp.f32 %v866_v25  ;;  %vm887_vm12 = vweird.f32 %v866_v25 }
 0x9e7   :  { %v871_v18 = vadd.f32 %v1264_v9, %v870_v5 }
 0x9e9   :  { %v875_v20 = vsel %vm874_vm8, %v1264_v9, %v871_v18 }
 0x9ea   :  { %v880_v22 = vsel %vm877_vm10, %v879_v19, %v875_v20 }
 0x9eb   :  { %v899_v23 = vmul.f32 %v1266_v21, %v880_v22  ;;  %v1270_v26 = vpop.eup %1269  ;;  %v898_v33 = vmul.f32 %v880_v22, %v815_v42 }
 0x9ec   :  { %v883_v29 = vmul.f32 %v1270_v26, %v866_v25  ;;  %vm888_vm11 = vweird.f32 %v1270_v26 }
 0x9ed   :  { %901 = vrot.lane.b32.xlu0 %v899_v23, %s1391_s1  ;;  %vm889_vm0 = vmor %vm887_vm12, %vm888_vm11 }
 0x9ee   :  { %v884_v30 = vsub.f32 1.0, %v883_v29 }
 0x9f0   :  { %v885_v31 = vmul.f32 %v1270_v26, %v884_v30 }
 0x9f2   :  { %v886_v37 = vadd.f32 %v1270_v26, %v885_v31 }
 0x9f4   :  { %v890_v38 = vsel %vm889_vm0, %v1270_v26, %v886_v37 }
 0x9f5   :  { %372 = vrot.lane.b32.xlu0 %v1509_v50, %s1391_s1  ;;  %v893_v50 = vand.u32 2147483648, %v866_v25 }
 0x9f7   :  { %v894_v7 = vor.u32 1.1754944e-38, %v893_v50 }
 0x9fd   :  { %641 = vrot.lane.b32.xlu0 %v1579_v15, %s1391_s1  ;;  %v891_v15 = vand.u32 2147483647, %v866_v25 }
 0x9ff   :  { %vm892_vm15 = vcmp.eq.f32.partialorder %v891_v15, 8.507059e+37 }
 0xa00   :  { %v895_v13 = vsel %vm892_vm15, %v894_v7, %v890_v38 }
 0xa5f   :  { %v902_v34 = vpop.permute.xlu0 %901 }
 0xa60   :  { %v1630_v35 = vadd.f32 %v902_v34, %v898_v33 }
 0xa62   :  { %1271 = vtanh.f32 %v1630_v35 }
 0xa67   :  { %v373_v39 = vpop.permute.xlu0 %372 }
 0xa68   :  { %v1272_v28 = vpop.eup %1271  ;;  %376 = vst.msk [vmem:[#allocation8] sm:$0xff] %vm375_vm13, %v373_v39 }
 0xa69   :  { %378 = vst.msk [vmem:[#allocation8 + $0x38] sm:$0xff] %vm377_vm14, %v373_v39  ;;  %v906_v40 = vmul.f32 %v1272_v28, %v895_v13 }
 0xa6b   :  { %908 = vrot.lane.b32.xlu0 %v906_v40, %s1391_s1  ;;  %v913_v36 = vpack.c.bf16 %v906_v40, %v906_v40 }
 0xa6d   :  { %915 = vrot.lane.b32.xlu1 %v913_v36, %s1391_s1 }
 0xa6f   :  { %v642_v27 = vpop.permute.xlu0 %641 }
 0xa70   :  { %644 = vst.msk [vmem:[#allocation8 + $0x18] sm:$0xff] %vm375_vm13, %v642_v27 }
 0xa71   :  { %645 = vst.msk [vmem:[#allocation8 + $0x20] sm:$0xff] %vm377_vm14, %v642_v27 }
 0xa75   :  { %463 = vrot.lane.b32.xlu1 %v1533_v41, %s1391_s1  ;;  %v212_v41 = vadd.f32 %v1608_v8, %v1499_v63 }
 0xa7d   :  { %730 = vrot.lane.b32.xlu1 %v1595_v62, %s1391_s1 }
 0xadd   :  { %v909_v42 = vpop.permute.xlu0 %908 }
 0xadf   :  { %v916_v46 = vpop.permute.xlu1 %915 }
 0xae0   :  { %1152 = vmatmul.msk.bf16.vlgmr.msra.gmra.mxu0 %vm291_vm9, %v916_v46  ;;  %1153 = vmatmul.msk.bf16.vlgmr.msra.gmra.mxu1 %vm291_vm9, %v916_v46 }
 0xae7   :  { %v464_v43 = vpop.permute.xlu1 %463 }
 0xae8   :  { %466 = vst.msk [vmem:[#allocation8 + $0x8] sm:$0xff] %vm375_vm13, %v464_v43 }
 0xae9   :  { %467 = vst.msk [vmem:[#allocation8 + $0x30] sm:$0xff] %vm377_vm14, %v464_v43 }
 0xaea   :  { %911 = vst.msk [vmem:[#allocation8 + $0x30] sm:$0xff] %vm375_vm13, %v909_v42 }
 0xaeb   :  { %912 = vst.msk [vmem:[#allocation8 + $0x8] sm:$0xff] %vm377_vm14, %v909_v42 }
 0xaef   :  { %v731_v44 = vpop.permute.xlu1 %730 }
 0xaf0   :  { %733 = vst.msk [vmem:[#allocation8 + $0x20] sm:$0xff] %vm375_vm13, %v731_v44 }
 0xaf1   :  { %734 = vst.msk [vmem:[#allocation8 + $0x18] sm:$0xff] %vm377_vm14, %v731_v44 }
 0xb5d   :  { %v929_v62 = vpop.f32.mrf.mxu0  ;;  %v942_v55 = vpop.f32.mrf.mxu1 }
 0xb5e   :  { %v946_v45 = vadd.f32 %v929_v62, %v212_v41  ;;  %v947_v57 = vadd.f32 %v942_v55, %v241_v53 }
 0xb60   :  { %v1154_v47 = vmul.f32 -1.442695, %v946_v45  ;;  %v1155_v11 = vmul.f32 -1.442695, %v947_v57 }
 0xb62   :  { %1273 = vpow2.f32 %v1154_v47 }
 0xb65   :  { %v931_v48 = vpop.f32.mrf.mxu0  ;;  %v944_v49 = vpop.f32.mrf.mxu1 }
 0xb68   :  { %v1274_v51 = vpop.eup %1273 }
 0xb69   :  { %v954_v54 = vadd.f32 1.0, %v1274_v51 }
 0xb6b   :  { %1275 = vrcp.f32 %v954_v54  ;;  %v967_v60 = vand.u32 2147483648, %v954_v54  ;;  %v965_v8 = vand.u32 2147483647, %v954_v54  ;;  %vm961_vm1 = vweird.f32 %v954_v54 }
 0xb6c   :  { %1277 = vtanh.f32 %v947_v57 }
 0xb6d   :  { %v968_v0 = vor.u32 1.1754944e-38, %v967_v60  ;;  %vm966_vm3 = vcmp.eq.f32.partialorder %v965_v8, 8.507059e+37  ;;  %1279 = vpow2.f32 %v1155_v11 }
 0xb71   :  { %v1276_v56 = vpop.eup %1275 }
 0xb72   :  { %v957_v58 = vmul.f32 %v1276_v56, %v954_v54  ;;  %vm962_vm9 = vweird.f32 %v1276_v56  ;;  %v1278_v2 = vpop.eup %1277 }
 0xb73   :  { %vm963_vm2 = vmor %vm961_vm1, %vm962_vm9  ;;  %v1280_v6 = vpop.eup %1279 }
 0xb74   :  { %v958_v59 = vsub.f32 1.0, %v957_v58  ;;  %v955_v10 = vadd.f32 1.0, %v1280_v6 }
 0xb76   :  { %v959_v63 = vmul.f32 %v1276_v56, %v958_v59  ;;  %1281 = vrcp.f32 %v955_v10  ;;  %vm976_vm5 = vweird.f32 %v955_v10  ;;  %v980_v21 = vand.u32 2147483647, %v955_v10 }
 0xb78   :  { %v960_v61 = vadd.f32 %v1276_v56, %v959_v63  ;;  %vm981_vm7 = vcmp.eq.f32.partialorder %v980_v21, 8.507059e+37 }
 0xb7a   :  { %v964_v1 = vsel %vm963_vm2, %v1276_v56, %v960_v61 }
 0xb7b   :  { %v969_v3 = vsel %vm966_vm3, %v968_v0, %v964_v1 }
 0xb7c   :  { %v988_v9 = vmul.f32 %v1278_v2, %v969_v3  ;;  %v1282_v12 = vpop.eup %1281  ;;  %v987_v17 = vmul.f32 %v969_v3, %v1630_v35 }
 0xb7d   :  { %v972_v14 = vmul.f32 %v1282_v12, %v955_v10  ;;  %vm977_vm4 = vweird.f32 %v1282_v12 }
 0xb7e   :  { %990 = vrot.lane.b32.xlu2 %v988_v9, %s1391_s1  ;;  %vm978_vm6 = vmor %vm976_vm5, %vm977_vm4 }
 0xb7f   :  { %v973_v16 = vsub.f32 1.0, %v972_v14 }
 0xb81   :  { %v974_v5 = vmul.f32 %v1282_v12, %v973_v16 }
 0xb83   :  { %v975_v20 = vadd.f32 %v1282_v12, %v974_v5 }
 0xb86   :  { %552 = vrot.lane.b32.xlu2 %v1555_v32, %s1391_s1  ;;  %v982_v32 = vand.u32 2147483648, %v955_v10 }
 0xb88   :  { %v983_v22 = vor.u32 1.1754944e-38, %v982_v32 }
 0xb8e   :  { %819 = vrot.lane.b32.xlu2 %v1614_v52, %s1391_s1  ;;  %v979_v52 = vsel %vm978_vm6, %v1282_v12, %v975_v20 }
 0xb8f   :  { %v984_v24 = vsel %vm981_vm7, %v983_v22, %v979_v52 }
 0xbd8   :  { %v991_v18 = vpop.permute.xlu2 %990 }
 0xbd9   :  { %v993_v19 = vadd.f32 %v991_v18, %v987_v17 }
 0xbdb   :  { %1283 = vtanh.f32 %v993_v19 }
 0xbe0   :  { %v553_v23 = vpop.permute.xlu2 %552 }
 0xbe1   :  { %v1284_v4 = vpop.eup %1283  ;;  %555 = vst.msk [vmem:[#allocation8 + $0x10] sm:$0xff] %vm375_vm13, %v553_v23 }
 0xbe2   :  { %556 = vst.msk [vmem:[#allocation8 + $0x28] sm:$0xff] %vm377_vm14, %v553_v23  ;;  %v995_v25 = vmul.f32 %v1284_v4, %v984_v24 }
 0xbe4   :  { %997 = vrot.lane.b32.xlu1 %v995_v25, %s1391_s1 }
 0xbe8   :  { %v820_v26 = vpop.permute.xlu2 %819 }
 0xbe9   :  { %822 = vst.msk [vmem:[#allocation8 + $0x28] sm:$0xff] %vm375_vm13, %v820_v26 }
 0xbea   :  { %823 = vst.msk [vmem:[#allocation8 + $0x10] sm:$0xff] %vm377_vm14, %v820_v26 }
 0xc56   :  { %v998_v29 = vpop.permute.xlu1 %997 }
 0xc57   :  { %1000 = vst.msk [vmem:[#allocation8 + $0x38] sm:$0xff] %vm375_vm13, %v998_v29 }
 0xc58   :  { %1001 = vst.msk [vmem:[#allocation8] sm:$0xff] %vm377_vm14, %v998_v29 }
 0xc59   :  { %1014 = dma.vmem_to_hbm [thread:$0]  %s1007_s7, 1024, %s1009_s10, [#allocation4], %s1388_s23, %s1388_s23, %s1389_s24  }
 0xc5a   :  { %1385 = dma.done.wait [#allocation4], 1024  }
 0xc5b   :  { %1386 = vsyncadd [#allocation4], 4294966272 }
 0xc5c   :  { %1019 = vsyncpa [#allocation3], 1 }
 0xc5d   :  { %1020 = vsyncpa [#allocation6], 1 }
 0xc5e   :  { %1021 = vsyncpa [#allocation4], 1 }

</bundles_post_ra>
